<compile_context>
chip_gen: v7x
topology: tpu7x:2x2x1
jax: 0.10.0
libtpu: 0.0.40
codegen_flags: <defaults>
</compile_context>

<pallas_src>
import functools

import jax
import jax.numpy as jnp
from jax import lax
from jax.experimental import pallas as pl
from jax.experimental.pallas import tpu as pltpu


def shared_moe_kernel(x_ref, wg_ref, bg_ref, wall_ref, bsh_ref, brm_ref,
                      out_ref, logits_ref, *, num_experts, top_k, hidden):
    H = hidden
    x = x_ref[...]                                                     # (tm, H) f32

    # ---- router gate in f32 (logits are a returned output; keep full precision) ----
    logits = jnp.dot(x, wg_ref[...], preferred_element_type=jnp.float32) + bg_ref[...]
    logits_ref[...] = logits.astype(logits_ref.dtype)

    # ---- softmax over experts ------------------------------------------------------
    m = jnp.max(logits, axis=-1, keepdims=True)
    ex = jnp.exp(logits - m)
    probs = ex / jnp.sum(ex, axis=-1, keepdims=True)                   # (tm, E)

    # ---- top-k selection (iterative masked max; tie-break = lowest index, = lax.top_k) ----
    tm_, E = probs.shape
    lane_idx = lax.broadcasted_iota(jnp.int32, (tm_, E), 1)
    work = probs
    sel_w = jnp.zeros_like(probs)
    for _ in range(top_k):
        cur_max = jnp.max(work, axis=-1, keepdims=True)
        hit = work == cur_max
        min_hit = jnp.min(jnp.where(hit, lane_idx, jnp.int32(E)), axis=-1, keepdims=True)
        pick = lane_idx == min_hit
        sel_w = jnp.where(pick, probs, sel_w)
        work = jnp.where(pick, -jnp.inf, work)
    sel_w = sel_w / jnp.sum(sel_w, axis=-1, keepdims=True)             # renormalize top-k weights

    # ---- one wide bf16 MXU matmul: x @ [W_shared | Wr_0 | ... | Wr_{E-1}] -----------
    xb = x.astype(wall_ref.dtype)                                      # bf16 for MXU
    h_all = jnp.dot(xb, wall_ref[...], preferred_element_type=jnp.float32)   # (tm, (E+1)*H) f32

    # shared experts (pre-summed into one linear) + weighted routed experts
    acc = h_all[:, :H] + bsh_ref[...]
    for e in range(num_experts):                                       # lane-aligned static slices
        acc = acc + sel_w[:, e:e + 1] * h_all[:, (e + 1) * H:(e + 2) * H]
    # routed biases as one tiny matmul instead of E broadcast multiply-adds
    acc = acc + jnp.dot(sel_w, brm_ref[...], preferred_element_type=jnp.float32)

    out_ref[...] = acc.astype(out_ref.dtype)


def shared_moe_forward(x, params, *, top_k, tm=128):
    B, S, H = x.shape
    T = B * S
    wg, bg, ws, bs, wr, br = (params[k] for k in ("wg", "bg", "ws", "bs", "wr", "br"))
    E = wg.shape[1]

    # Pre-fold shared experts: sum of linear layers is exactly one linear layer.
    w_shared = jnp.sum(ws, axis=0)                                     # (H, H) f32
    b_shared = jnp.sum(bs, axis=0)                                     # (1, H) f32
    # Fuse all expert weights along the output dim; cast to bf16 so DMAs are half-width
    # and the MXU runs at bf16 rates (accumulation stays f32 inside the kernel).
    w_all = jnp.concatenate([w_shared] + [wr[e] for e in range(E)],
                            axis=1).astype(jnp.bfloat16)               # (H, (E+1)*H) bf16
    br_mat = br[:, 0, :]                                               # (E, H) f32

    # Pad the token count up to a multiple of tm (128-row MXU tiles); slice off afterwards.
    grid_t = pl.cdiv(T, tm)
    T_pad = grid_t * tm
    xf = x.reshape(T, H)
    if T_pad != T:
        xf = jnp.pad(xf, ((0, T_pad - T), (0, 0)))

    out_pad, logits_pad = pl.pallas_call(
        functools.partial(shared_moe_kernel, num_experts=E, top_k=top_k, hidden=H),
        out_shape=(
            jax.ShapeDtypeStruct((T_pad, H), x.dtype),
            jax.ShapeDtypeStruct((T_pad, E), jnp.float32),
        ),
        grid_spec=pltpu.PrefetchScalarGridSpec(
            num_scalar_prefetch=0,
            grid=(grid_t,),
            in_specs=[
                pl.BlockSpec((tm, H), lambda i: (i, 0)),               # x token tile (f32)
                pl.BlockSpec((H, E), lambda i: (0, 0)),                # gate weight (resident)
                pl.BlockSpec((1, E), lambda i: (0, 0)),                # gate bias
                pl.BlockSpec((H, (E + 1) * H), lambda i: (0, 0)),      # fused [shared|routed] weights (bf16)
                pl.BlockSpec((1, H), lambda i: (0, 0)),                # pre-summed shared bias
                pl.BlockSpec((E, H), lambda i: (0, 0)),                # routed biases (E, H)
            ],
            out_specs=(
                pl.BlockSpec((tm, H), lambda i: (i, 0)),
                pl.BlockSpec((tm, E), lambda i: (i, 0)),
            ),
        ),
        compiler_params=pltpu.CompilerParams(
            dimension_semantics=("parallel",),
        ),
    )(xf, wg, bg, w_all, b_shared, br_mat)

    return out_pad[:T].reshape(B, S, H), logits_pad[:T]


def init_params(key, hidden_dim, num_experts):
    """Deterministic synthetic params (nn.Linear-style uniform init)."""
    ks = jax.random.split(key, 6)
    lim = 1.0 / jnp.sqrt(hidden_dim)
    wg = jax.random.uniform(ks[0], (hidden_dim, num_experts), jnp.float32, -lim, lim)
    bg = jax.random.uniform(ks[1], (1, num_experts), jnp.float32, -lim, lim)
    ws = jax.random.uniform(ks[2], (num_experts, hidden_dim, hidden_dim), jnp.float32, -lim, lim)
    bs = jax.random.uniform(ks[3], (num_experts, 1, hidden_dim), jnp.float32, -lim, lim)
    wr = jax.random.uniform(ks[4], (num_experts, hidden_dim, hidden_dim), jnp.float32, -lim, lim)
    br = jax.random.uniform(ks[5], (num_experts, 1, hidden_dim), jnp.float32, -lim, lim)
    return dict(wg=wg, bg=bg, ws=ws, bs=bs, wr=wr, br=br)


def reference_forward(x, params, *, top_k):
    """Pure-JAX f32 reference matching the PyTorch module semantics."""
    B, S, H = x.shape
    xf = x.reshape(-1, H)
    T = xf.shape[0]
    wg, bg, ws, bs, wr, br = (params[k] for k in ("wg", "bg", "ws", "bs", "wr", "br"))
    E = wg.shape[1]

    logits = xf @ wg + bg[0]
    probs = jax.nn.softmax(logits, axis=-1)
    topv, topi = lax.top_k(probs, top_k)
    topv = topv / jnp.sum(topv, axis=-1, keepdims=True)
    w_dense = jnp.zeros_like(probs).at[jnp.arange(T)[:, None], topi].set(topv)

    shared = jnp.zeros_like(xf)
    routed = jnp.zeros_like(xf)
    for e in range(E):
        shared = shared + (xf @ ws[e] + bs[e, 0])
        routed = routed + w_dense[:, e:e + 1] * (xf @ wr[e] + br[e, 0])
    return (shared + routed).reshape(B, S, H), logits


if __name__ == "__main__":
    batch, seq, hidden = 2, 8, 128
    num_experts, top_k = 4, 2

    key = jax.random.PRNGKey(0)
    k_x, k_p = jax.random.split(key)
    x = jax.random.normal(k_x, (batch, seq, hidden), jnp.float32)
    params = init_params(k_p, hidden, num_experts)

    out, logits = shared_moe_forward(x, params, top_k=top_k)
    out = jax.block_until_ready(out)
    logits = jax.block_until_ready(logits)

    out_ref, logits_ref = reference_forward(x, params, top_k=top_k)
    assert out.shape == (batch, seq, hidden)
    assert logits.shape == (batch * seq, num_experts)
    # Logits are computed in f32 -> tight tolerance (routing decisions match the reference).
    assert jnp.allclose(logits, logits_ref, rtol=1e-3, atol=1e-3)
    # Expert matmuls use bf16 MXU inputs with f32 accumulation -> looser tolerance.
    assert jnp.allclose(out, out_ref, rtol=5e-2, atol=5e-2)

    print("KERNEL_OK")
</pallas_src>

<mosaic_0001>
module attributes {stable_mosaic.version = 11 : i64} {
  func.func @shared_moe_kernel(%arg0: i32, %arg1: memref<128x128xf32, #tpu.memory_space<vmem>>, %arg2: memref<128x4xf32, #tpu.memory_space<vmem>>, %arg3: memref<1x4xf32, #tpu.memory_space<vmem>>, %arg4: memref<128x640xbf16, #tpu.memory_space<vmem>>, %arg5: memref<1x128xf32, #tpu.memory_space<vmem>>, %arg6: memref<4x128xf32, #tpu.memory_space<vmem>>, %arg7: memref<128x128xf32, #tpu.memory_space<vmem>>, %arg8: memref<128x4xf32, #tpu.memory_space<vmem>>) attributes {dimension_semantics = [#tpu.dimension_semantics<parallel>], iteration_bounds = array<i64: 1>, scalar_prefetch = 0 : i64, scratch_operands = 0 : i64, tpu.core_type = #tpu.core_type<tc>, window_params = [{transform_indices = @transform_0, window_bounds = array<i64: 128, 128>}, {pipeline_mode = #tpu.pipeline_mode<synchronous>, transform_indices = @transform_1, window_bounds = array<i64: 128, 4>}, {pipeline_mode = #tpu.pipeline_mode<synchronous>, transform_indices = @transform_2, window_bounds = array<i64: 1, 4>}, {pipeline_mode = #tpu.pipeline_mode<synchronous>, transform_indices = @transform_3, window_bounds = array<i64: 128, 640>}, {pipeline_mode = #tpu.pipeline_mode<synchronous>, transform_indices = @transform_4, window_bounds = array<i64: 1, 128>}, {pipeline_mode = #tpu.pipeline_mode<synchronous>, transform_indices = @transform_5, window_bounds = array<i64: 4, 128>}, {transform_indices = @transform_6, window_bounds = array<i64: 128, 128>}, {transform_indices = @transform_7, window_bounds = array<i64: 128, 4>}]} {
    %c0 = arith.constant 0 : index
    %c0_0 = arith.constant 0 : index
    %0 = vector.load %arg1[%c0, %c0_0] : memref<128x128xf32, #tpu.memory_space<vmem>>, vector<128x128xf32>
    %c0_1 = arith.constant 0 : index
    %c0_2 = arith.constant 0 : index
    %1 = vector.load %arg2[%c0_1, %c0_2] : memref<128x4xf32, #tpu.memory_space<vmem>>, vector<128x4xf32>
    %cst = arith.constant dense<0.000000e+00> : vector<128x4xf32>
    %2 = tpu.matmul %0, %1, %cst {dimension_numbers = #tpu.dot_dimension_numbers<[1], [0], [0], [1], [0, 0, 1, 1], [], []>} : vector<128x128xf32>, vector<128x4xf32>, vector<128x4xf32> -> vector<128x4xf32>
    %c0_3 = arith.constant 0 : index
    %c0_4 = arith.constant 0 : index
    %3 = vector.load %arg3[%c0_3, %c0_4] : memref<1x4xf32, #tpu.memory_space<vmem>>, vector<1x4xf32>
    %4 = vector.broadcast %3 : vector<1x4xf32> to vector<128x4xf32>
    %5 = arith.addf %2, %4 : vector<128x4xf32>
    %c0_5 = arith.constant 0 : index
    %c0_6 = arith.constant 0 : index
    %6 = vector.load %arg8[%c0_5, %c0_6] : memref<128x4xf32, #tpu.memory_space<vmem>>, vector<128x4xf32>
    tpu.vector_store %arg8[%c0_5, %c0_6], %5 {strides = array<i32>} : memref<128x4xf32, #tpu.memory_space<vmem>>, vector<128x4xf32>,
    %cst_7 = arith.constant dense<0xFF800000> : vector<128xf32>
    %7 = vector.multi_reduction <maximumf>, %5, %cst_7 [1] : vector<128x4xf32> to vector<128xf32>
    %8 = vector.shape_cast %7 : vector<128xf32> to vector<128x1xf32>
    %9 = vector.broadcast %8 : vector<128x1xf32> to vector<128x4xf32>
    %10 = arith.subf %5, %9 : vector<128x4xf32>
    %11 = math.exp %10 : vector<128x4xf32>
    %cst_8 = arith.constant dense<0.000000e+00> : vector<128xf32>
    %12 = vector.multi_reduction <add>, %11, %cst_8 [1] : vector<128x4xf32> to vector<128xf32>
    %13 = vector.shape_cast %12 : vector<128xf32> to vector<128x1xf32>
    %14 = vector.broadcast %13 : vector<128x1xf32> to vector<128x4xf32>
    %15 = arith.divf %11, %14 : vector<128x4xf32>
    %16 = tpu.iota {dimensions = array<i32: 1>} : vector<128x4xi32>
    %cst_9 = arith.constant 0.000000e+00 : f32
    %17 = vector.broadcast %cst_9 : f32 to vector<128x4xf32>
    %cst_10 = arith.constant dense<0xFF800000> : vector<128xf32>
    %18 = vector.multi_reduction <maximumf>, %15, %cst_10 [1] : vector<128x4xf32> to vector<128xf32>
    %19 = vector.shape_cast %18 : vector<128xf32> to vector<128x1xf32>
    %20 = vector.broadcast %19 : vector<128x1xf32> to vector<128x4xf32>
    %21 = arith.cmpf oeq, %15, %20 : vector<128x4xf32>
    %c4_i32 = arith.constant 4 : i32
    %22 = vector.broadcast %c4_i32 : i32 to vector<128x4xi32>
    %23 = arith.select %21, %16, %22 : vector<128x4xi1>, vector<128x4xi32>
    %cst_11 = arith.constant dense<2147483647> : vector<128xi32>
    %24 = vector.multi_reduction <minsi>, %23, %cst_11 [1] : vector<128x4xi32> to vector<128xi32>
    %25 = vector.shape_cast %24 : vector<128xi32> to vector<128x1xi32>
    %26 = vector.broadcast %25 : vector<128x1xi32> to vector<128x4xi32>
    %27 = arith.cmpi eq, %16, %26 : vector<128x4xi32>
    %28 = arith.select %27, %15, %17 : vector<128x4xi1>, vector<128x4xf32>
    %cst_12 = arith.constant 0xFF800000 : f32
    %29 = vector.broadcast %cst_12 : f32 to vector<128x4xf32>
    %30 = arith.select %27, %29, %15 : vector<128x4xi1>, vector<128x4xf32>
    %cst_13 = arith.constant dense<0xFF800000> : vector<128xf32>
    %31 = vector.multi_reduction <maximumf>, %30, %cst_13 [1] : vector<128x4xf32> to vector<128xf32>
    %32 = vector.shape_cast %31 : vector<128xf32> to vector<128x1xf32>
    %33 = vector.broadcast %32 : vector<128x1xf32> to vector<128x4xf32>
    %34 = arith.cmpf oeq, %30, %33 : vector<128x4xf32>
    %c4_i32_14 = arith.constant 4 : i32
    %35 = vector.broadcast %c4_i32_14 : i32 to vector<128x4xi32>
    %36 = arith.select %34, %16, %35 : vector<128x4xi1>, vector<128x4xi32>
    %cst_15 = arith.constant dense<2147483647> : vector<128xi32>
    %37 = vector.multi_reduction <minsi>, %36, %cst_15 [1] : vector<128x4xi32> to vector<128xi32>
    %38 = vector.shape_cast %37 : vector<128xi32> to vector<128x1xi32>
    %39 = vector.broadcast %38 : vector<128x1xi32> to vector<128x4xi32>
    %40 = arith.cmpi eq, %16, %39 : vector<128x4xi32>
    %41 = arith.select %40, %15, %28 : vector<128x4xi1>, vector<128x4xf32>
    %cst_16 = arith.constant dense<0.000000e+00> : vector<128xf32>
    %42 = vector.multi_reduction <add>, %41, %cst_16 [1] : vector<128x4xf32> to vector<128xf32>
    %43 = vector.shape_cast %42 : vector<128xf32> to vector<128x1xf32>
    %44 = vector.broadcast %43 : vector<128x1xf32> to vector<128x4xf32>
    %45 = arith.divf %41, %44 : vector<128x4xf32>
    %46 = arith.truncf %0 : vector<128x128xf32> to vector<128x128xbf16>
    %c0_17 = arith.constant 0 : index
    %c0_18 = arith.constant 0 : index
    %47 = vector.load %arg4[%c0_17, %c0_18] : memref<128x640xbf16, #tpu.memory_space<vmem>>, vector<128x640xbf16>
    %cst_19 = arith.constant dense<0.000000e+00> : vector<128x640xf32>
    %48 = tpu.matmul %46, %47, %cst_19 {dimension_numbers = #tpu.dot_dimension_numbers<[1], [0], [0], [1], [0, 0, 1, 1], [], []>} : vector<128x128xbf16>, vector<128x640xbf16>, vector<128x640xf32> -> vector<128x640xf32>
    %49 = vector.extract_strided_slice %48 {offsets = [0, 0], sizes = [128, 128], strides = [1, 1]} : vector<128x640xf32> to vector<128x128xf32>
    %c0_20 = arith.constant 0 : index
    %c0_21 = arith.constant 0 : index
    %50 = vector.load %arg5[%c0_20, %c0_21] : memref<1x128xf32, #tpu.memory_space<vmem>>, vector<1x128xf32>
    %51 = vector.broadcast %50 : vector<1x128xf32> to vector<128x128xf32>
    %52 = arith.addf %49, %51 : vector<128x128xf32>
    %53 = vector.extract_strided_slice %45 {offsets = [0, 0], sizes = [128, 1], strides = [1, 1]} : vector<128x4xf32> to vector<128x1xf32>
    %54 = vector.extract_strided_slice %48 {offsets = [0, 128], sizes = [128, 128], strides = [1, 1]} : vector<128x640xf32> to vector<128x128xf32>
    %55 = vector.broadcast %53 : vector<128x1xf32> to vector<128x128xf32>
    %56 = arith.mulf %55, %54 : vector<128x128xf32>
    %57 = arith.addf %52, %56 : vector<128x128xf32>
    %58 = vector.extract_strided_slice %45 {offsets = [0, 1], sizes = [128, 1], strides = [1, 1]} : vector<128x4xf32> to vector<128x1xf32>
    %59 = vector.extract_strided_slice %48 {offsets = [0, 256], sizes = [128, 128], strides = [1, 1]} : vector<128x640xf32> to vector<128x128xf32>
    %60 = vector.broadcast %58 : vector<128x1xf32> to vector<128x128xf32>
    %61 = arith.mulf %60, %59 : vector<128x128xf32>
    %62 = arith.addf %57, %61 : vector<128x128xf32>
    %63 = vector.extract_strided_slice %45 {offsets = [0, 2], sizes = [128, 1], strides = [1, 1]} : vector<128x4xf32> to vector<128x1xf32>
    %64 = vector.extract_strided_slice %48 {offsets = [0, 384], sizes = [128, 128], strides = [1, 1]} : vector<128x640xf32> to vector<128x128xf32>
    %65 = vector.broadcast %63 : vector<128x1xf32> to vector<128x128xf32>
    %66 = arith.mulf %65, %64 : vector<128x128xf32>
    %67 = arith.addf %62, %66 : vector<128x128xf32>
    %68 = vector.extract_strided_slice %45 {offsets = [0, 3], sizes = [128, 1], strides = [1, 1]} : vector<128x4xf32> to vector<128x1xf32>
    %69 = vector.extract_strided_slice %48 {offsets = [0, 512], sizes = [128, 128], strides = [1, 1]} : vector<128x640xf32> to vector<128x128xf32>
    %70 = vector.broadcast %68 : vector<128x1xf32> to vector<128x128xf32>
    %71 = arith.mulf %70, %69 : vector<128x128xf32>
    %72 = arith.addf %67, %71 : vector<128x128xf32>
    %c0_22 = arith.constant 0 : index
    %c0_23 = arith.constant 0 : index
    %73 = vector.load %arg6[%c0_22, %c0_23] : memref<4x128xf32, #tpu.memory_space<vmem>>, vector<4x128xf32>
    %cst_24 = arith.constant dense<0.000000e+00> : vector<128x128xf32>
    %74 = tpu.matmul %45, %73, %cst_24 {dimension_numbers = #tpu.dot_dimension_numbers<[1], [0], [0], [1], [0, 0, 1, 1], [], []>} : vector<128x4xf32>, vector<4x128xf32>, vector<128x128xf32> -> vector<128x128xf32>
    %75 = arith.addf %72, %74 : vector<128x128xf32>
    %c0_25 = arith.constant 0 : index
    %c0_26 = arith.constant 0 : index
    %76 = vector.load %arg7[%c0_25, %c0_26] : memref<128x128xf32, #tpu.memory_space<vmem>>, vector<128x128xf32>
    tpu.vector_store %arg7[%c0_25, %c0_26], %75 {strides = array<i32>} : memref<128x128xf32, #tpu.memory_space<vmem>>, vector<128x128xf32>,
    return
  }
  func.func @transform_0(%arg0: i32) -> (i32, i32) {
    %c0_i32 = arith.constant 0 : i32
    %c0_i32_0 = arith.constant 0 : i32
    return %arg0, %c0_i32 : i32, i32
  }
  func.func @transform_1(%arg0: i32) -> (i32, i32) {
    %c0_i32 = arith.constant 0 : i32
    %c0_i32_0 = arith.constant 0 : i32
    %c0_i32_1 = arith.constant 0 : i32
    return %c0_i32, %c0_i32_0 : i32, i32
  }
  func.func @transform_2(%arg0: i32) -> (i32, i32) {
    %c0_i32 = arith.constant 0 : i32
    %c0_i32_0 = arith.constant 0 : i32
    %c0_i32_1 = arith.constant 0 : i32
    return %c0_i32, %c0_i32_0 : i32, i32
  }
  func.func @transform_3(%arg0: i32) -> (i32, i32) {
    %c0_i32 = arith.constant 0 : i32
    %c0_i32_0 = arith.constant 0 : i32
    %c0_i32_1 = arith.constant 0 : i32
    return %c0_i32, %c0_i32_0 : i32, i32
  }
  func.func @transform_4(%arg0: i32) -> (i32, i32) {
    %c0_i32 = arith.constant 0 : i32
    %c0_i32_0 = arith.constant 0 : i32
    %c0_i32_1 = arith.constant 0 : i32
    return %c0_i32, %c0_i32_0 : i32, i32
  }
  func.func @transform_5(%arg0: i32) -> (i32, i32) {
    %c0_i32 = arith.constant 0 : i32
    %c0_i32_0 = arith.constant 0 : i32
    %c0_i32_1 = arith.constant 0 : i32
    return %c0_i32, %c0_i32_0 : i32, i32
  }
  func.func @transform_6(%arg0: i32) -> (i32, i32) {
    %c0_i32 = arith.constant 0 : i32
    %c0_i32_0 = arith.constant 0 : i32
    return %arg0, %c0_i32 : i32, i32
  }
  func.func @transform_7(%arg0: i32) -> (i32, i32) {
    %c0_i32 = arith.constant 0 : i32
    %c0_i32_0 = arith.constant 0 : i32
    return %arg0, %c0_i32 : i32, i32
  }
}

</mosaic_0001>

<bundles_post_ra>
// kernel: tpu_custom_call.1
= control target key start
LH: loop header
LB: loop body
LE: loop exit
PB: predicated region body
PF: predicated region fallthrough
CT: control target
= control target key end

     0   :  { %13 = vsyncpa [#allocation3], 0  ;;  %s4915_s0 = inlined_call_operand.vmem [shape: f32[128,128], index: 0, kind: input, shape index: {}]   ;;  %s4916_s1 = inlined_call_operand.vmem [shape: f32[128,4], index: 1, kind: input, shape index: {}]   ;;  %s4917_s2 = inlined_call_operand.vmem [shape: f32[1,4], index: 2, kind: input, shape index: {}]   ;;  %s4918_s3 = inlined_call_operand.hbm [shape: bf16[128,640], index: 3, kind: input, shape index: {}]   ;;  %s4919_s4 = inlined_call_operand.vmem [shape: f32[1,128], index: 4, kind: input, shape index: {}]   ;;  %s4920_s5 = inlined_call_operand.vmem [shape: f32[4,128], index: 5, kind: input, shape index: {}]   ;;  %s4921_s6 = inlined_call_operand.hbm [shape: f32[128,128], index: 6, kind: output, shape index: {0}]   ;;  %s4922_s7 = inlined_call_operand.vmem [shape: f32[128,4], index: 7, kind: output, shape index: {1}]  }
   0x1   :  { %14 = vsyncpa [#allocation4], 0  ;;  %s3009_s24 = smov [#allocation2]   ;;  %s2961_s28 = scalar_lea.hbm %s4918_s3, 5120 }
   0x2   :  { %s26_s25 = sshll.u32 %s3009_s24, 4  ;;  %p2962_p0 = scmp.ne.s32.totalorder %s4918_s3, %s2961_s28  ;;  %s27_s25 = int_to_ptr.vmem [resolvable:$true] %s26_s25 }
   0x3   :  { %p2965_p1 = scmp.lt.u32.totalorder %s2961_s28, %s4918_s3 }
   0x5   :  { %p2967_p2 = pnand %p2965_p1, %p2962_p0 }
   0x7   :  { %2970 = shalt.err (!%p2967_p2)
}
   0x8   :  { %s2971_s10 = scalar_lea.vmem %s27_s25, 5120  ;;  %p2976_p4 = scmp.lt.s32.totalorder %s27_s25, %s27_s25 }
   0x9   :  { %p2972_p3 = scmp.ne.s32.totalorder %s27_s25, %s2971_s10  ;;  %p2977_p5 = scmp.lt.s32.totalorder %s2971_s10, %s2971_s10 }
   0xb   :  { %p2978_p6 = por %p2977_p5, %p2976_p4 }
   0xd   :  { %p2979_p7 = pnand %p2978_p6, %p2972_p3 }
   0xf   :  { %2982 = shalt.err (!%p2979_p7)
}
  0x10   :  { %s3010_s11 = smov 320   ;;  %s3011_s12 = smov 20  }
  0x11   :  { %32 = dma.hbm_to_vmem [thread:$0]  %s4918_s3, 5120, %s27_s25, [#allocation3], %s3010_s11, %s3010_s11, %s3011_s12  }
  0x12   :  { %3005 = dma.done.wait [#allocation3], 5120  }
  0x13   :  { %3006 = vsyncadd [#allocation3], 4294962176  ;;  %v57_v0 = vld [vmem:[%s4916_s1] sm:$0xff]  ;;  %v58_v1 = vld [vmem:[%s4916_s1 + $0x8] sm:$0xff]  ;;  %vm225_vm0 = vcmask 31744  }
  0x14   :  { %v59_v2 = vld [vmem:[%s4916_s1 + $0x10] sm:$0xff]  ;;  %v2703_v3 = vpack.c.bf16 %v58_v1, %v57_v0  ;;  %v60_v4 = vld [vmem:[%s4916_s1 + $0x18] sm:$0xff]  ;;  %v61_v6 = vld [vmem:[%s4916_s1 + $0x20] sm:$0xff] }
  0x15   :  { %v2707_v5 = vpack.c.bf16 %v60_v4, %v59_v2  ;;  %v62_v7 = vld [vmem:[%s4916_s1 + $0x28] sm:$0xff]  ;;  %v63_v8 = vld [vmem:[%s4916_s1 + $0x30] sm:$0xff]  ;;  %v64_v10 = vld [vmem:[%s4916_s1 + $0x38] sm:$0xff] }
  0x16   :  { %2704 = vmatprep.subr.bf16.mxu0 %v2703_v3  ;;  %v2711_v9 = vpack.c.bf16 %v62_v7, %v61_v6  ;;  %v41_v11 = vld [vmem:[%s4915_s0] sm:$0xff]  ;;  %v42_v12 = vld [vmem:[%s4915_s0 + $0x8] sm:$0xff]  ;;  %v43_v14 = vld [vmem:[%s4915_s0 + $0x10] sm:$0xff]  ;;  %v2715_v28 = vpack.c.bf16 %v64_v10, %v63_v8 }
  0x17   :  { %2706 = vmatpush3.bf16.msra.mxu0 %v2703_v3  ;;  %2621 = vmatprep.mubr.f32.mxu0 %v41_v11  ;;  %v3101_v13 = vpack.c.bf16 %v42_v12, %v41_v11  ;;  %v44_v15 = vld [vmem:[%s4915_s0 + $0x18] sm:$0xff]  ;;  %v45_v16 = vld [vmem:[%s4915_s0 + $0x20] sm:$0xff]  ;;  %v46_v18 = vld [vmem:[%s4915_s0 + $0x28] sm:$0xff] }
  0x18   :  { %2708 = vmatprep.subr.bf16.mxu0 %v2707_v5  ;;  %v3112_v17 = vpack.c.bf16 %v44_v15, %v43_v14  ;;  %v47_v19 = vld [vmem:[%s4915_s0 + $0x30] sm:$0xff]  ;;  %v48_v20 = vld [vmem:[%s4915_s0 + $0x38] sm:$0xff]  ;;  %v65_v21 = vld [vmem:[%s4916_s1 + $0x40] sm:$0xff]  ;;  %v3129_v23 = vpack.c.bf16 %v46_v18, %v45_v16 }
  0x19   :  { %v66_v22 = vld [vmem:[%s4916_s1 + $0x48] sm:$0xff]  ;;  %v3131_v24 = vpack.c.bf16 %v48_v20, %v47_v19  ;;  %v49_v25 = vld [vmem:[%s4915_s0 + $0x40] sm:$0xff]  ;;  %v51_v27 = vld [vmem:[%s4915_s0 + $0x50] sm:$0xff] }
  0x1a   :  { %v50_v26 = vld [vmem:[%s4915_s0 + $0x48] sm:$0xff]  ;;  %v52_v30 = vld [vmem:[%s4915_s0 + $0x58] sm:$0xff]  ;;  %v53_v31 = vld [vmem:[%s4915_s0 + $0x60] sm:$0xff]  ;;  %v2719_v40 = vpack.c.bf16 %v66_v22, %v65_v21 }
  0x1b   :  { %2710 = vmatpush3.bf16.msra.mxu0 %v2707_v5  ;;  %v3142_v29 = vpack.c.bf16 %v50_v26, %v49_v25  ;;  %v54_v32 = vld [vmem:[%s4915_s0 + $0x68] sm:$0xff]  ;;  %v3153_v33 = vpack.c.bf16 %v52_v30, %v51_v27  ;;  %v55_v35 = vld [vmem:[%s4915_s0 + $0x70] sm:$0xff]  ;;  %v56_v36 = vld [vmem:[%s4915_s0 + $0x78] sm:$0xff] }
  0x1c   :  { %2712 = vmatprep.subr.bf16.mxu0 %v2711_v9  ;;  %v3155_v34 = vpack.c.bf16 %v54_v32, %v53_v31  ;;  %v3163_v37 = vpack.c.bf16 %v56_v36, %v55_v35  ;;  %v67_v38 = vld [vmem:[%s4916_s1 + $0x50] sm:$0xff]  ;;  %v68_v39 = vld [vmem:[%s4916_s1 + $0x58] sm:$0xff]  ;;  %v69_v41 = vld [vmem:[%s4916_s1 + $0x60] sm:$0xff] }
  0x1d   :  { %v70_v42 = vld [vmem:[%s4916_s1 + $0x68] sm:$0xff]  ;;  %v2723_v43 = vpack.c.bf16 %v68_v39, %v67_v38  ;;  %v71_v44 = vld [vmem:[%s4916_s1 + $0x70] sm:$0xff]  ;;  %v72_v45 = vld [vmem:[%s4916_s1 + $0x78] sm:$0xff] }
  0x1e   :  { %4965 = vst [vmem:[#allocation8_spill] sm:$0xff] %v3155_v34  ;;  %4966 = vst [vmem:[#allocation9_spill] sm:$0xff] %v3163_v37  ;;  %v2727_v46 = vpack.c.bf16 %v70_v42, %v69_v41  ;;  %v2731_v47 = vpack.c.bf16 %v72_v45, %v71_v44  ;;  %v3186_v48 = vld [vmem:[%s4917_s2] ss:$0 sm:$0xff] }
  0x1f   :  { %2714 = vmatpush3.bf16.msra.mxu0 %v2711_v9 }
  0x20   :  { %2716 = vmatprep.subr.bf16.mxu0 %v2715_v28 }
  0x23   :  { %2718 = vmatpush3.bf16.msra.mxu0 %v2715_v28 }
  0x24   :  { %2720 = vmatprep.subr.bf16.mxu0 %v2719_v40 }
  0x27   :  { %2722 = vmatpush3.bf16.msra.mxu0 %v2719_v40 }
  0x28   :  { %2724 = vmatprep.subr.bf16.mxu0 %v2723_v43 }
  0x2b   :  { %2726 = vmatpush3.bf16.msra.mxu0 %v2723_v43 }
  0x2c   :  { %2728 = vmatprep.subr.bf16.mxu0 %v2727_v46 }
  0x2f   :  { %2730 = vmatpush3.bf16.msra.mxu0 %v2727_v46 }
  0x30   :  { %2732 = vmatprep.subr.bf16.mxu0 %v2731_v47 }
  0x33   :  { %2734 = vmatpush3.bf16.msra.mxu0 %v2731_v47 }
  0x36   :  { %2622 = vmatmul.mubr.f32.vlgmr.msra.gmra.mrb[0].mxu0 %v42_v12 }
  0x37   :  { %2624 = vmatprep.mubr.f32.mxu0 %v43_v14 }
  0x3a   :  { %2625 = vmatmul.mubr.f32.gmra.mrb[2].mxu0 %v44_v15 }
  0x3b   :  { %2627 = vmatprep.mubr.f32.mxu0 %v45_v16 }
  0x3e   :  { %2628 = vmatmul.mubr.f32.gmra.mrb[4].mxu0 %v46_v18 }
  0x3f   :  { %2630 = vmatprep.mubr.f32.mxu0 %v47_v19 }
  0x42   :  { %2631 = vmatmul.mubr.f32.gmra.mrb[6].mxu0 %v48_v20 }
  0x43   :  { %2633 = vmatprep.mubr.f32.mxu0 %v49_v25 }
  0x46   :  { %2634 = vmatmul.mubr.f32.gmra.mrb[8].mxu0 %v50_v26 }
  0x47   :  { %2636 = vmatprep.mubr.f32.mxu0 %v51_v27 }
  0x4a   :  { %2637 = vmatmul.mubr.f32.gmra.mrb[10].mxu0 %v52_v30 }
  0x4b   :  { %2639 = vmatprep.mubr.f32.mxu0 %v53_v31 }
  0x4e   :  { %2640 = vmatmul.mubr.f32.gmra.mrb[12].mxu0 %v54_v32 }
  0x4f   :  { %2642 = vmatprep.mubr.f32.mxu0 %v55_v35 }
  0x52   :  { %2643 = vmatmul.mubr.f32.gmra.mrb[14].mxu0 %v56_v36 }
 0x109   :  { %v2623_v49 = vpop.f32.mrb[0].mxu0 }
 0x10a   :  { %v3189_v50 = vadd.f32 %v2623_v49, %v3186_v48  ;;  %v146_v51 = vpop.f32.mrb[1].mxu0 }
 0x10b   :  { %v3192_v52 = vadd.f32 %v3186_v48, %v146_v51 }
 0x10c   :  { %227 = vst.msk [vmem:[%s4922_s7 + $0x8] sm:$0xff] %vm225_vm0, %v3189_v50  ;;  %v245_v53 = vsel %vm225_vm0, %v3189_v50, -inf }
 0x10d   :  { %226 = vst.msk [vmem:[%s4922_s7] sm:$0xff] %vm225_vm0, %v3192_v52  ;;  %246 = vmax.xlane.f32.xlu1 %v245_v53  ;;  %v2626_v54 = vpop.f32.mrb[2].mxu0  ;;  %v242_v55 = vsel %vm225_vm0, %v3192_v52, -inf }
 0x10e   :  { %v3209_v56 = vadd.f32 %v2626_v54, %v3186_v48  ;;  %243 = vmax.xlane.f32.xlu0 %v242_v55  ;;  %v156_v57 = vpop.f32.mrb[3].mxu0 }
 0x10f   :  { %v3212_v58 = vadd.f32 %v3186_v48, %v156_v57 }
 0x110   :  { %229 = vst.msk [vmem:[%s4922_s7 + $0x18] sm:$0xff] %vm225_vm0, %v3209_v56  ;;  %v251_v59 = vsel %vm225_vm0, %v3209_v56, -inf }
 0x111   :  { %228 = vst.msk [vmem:[%s4922_s7 + $0x10] sm:$0xff] %vm225_vm0, %v3212_v58  ;;  %v2629_v60 = vpop.f32.mrb[4].mxu0  ;;  %v248_v0 = vsel %vm225_vm0, %v3212_v58, -inf }
 0x112   :  { %252 = vmax.xlane.f32.xlu0 %v251_v59  ;;  %v3227_v61 = vadd.f32 %v2629_v60, %v3186_v48  ;;  %v166_v62 = vpop.f32.mrb[5].mxu0 }
 0x113   :  { %v3230_v63 = vadd.f32 %v3186_v48, %v166_v62 }
 0x114   :  { %231 = vst.msk [vmem:[%s4922_s7 + $0x28] sm:$0xff] %vm225_vm0, %v3227_v61  ;;  %v257_v25 = vsel %vm225_vm0, %v3227_v61, -inf }
 0x115   :  { %230 = vst.msk [vmem:[%s4922_s7 + $0x20] sm:$0xff] %vm225_vm0, %v3230_v63  ;;  %v2632_v1 = vpop.f32.mrb[6].mxu0  ;;  %v254_v16 = vsel %vm225_vm0, %v3230_v63, -inf }
 0x116   :  { %249 = vmax.xlane.f32.xlu0 %v248_v0  ;;  %v3245_v2 = vadd.f32 %v2632_v1, %v3186_v48  ;;  %v176_v3 = vpop.f32.mrb[7].mxu0 }
 0x117   :  { %v3248_v4 = vadd.f32 %v3186_v48, %v176_v3 }
 0x118   :  { %233 = vst.msk [vmem:[%s4922_s7 + $0x38] sm:$0xff] %vm225_vm0, %v3245_v2  ;;  %v263_v38 = vsel %vm225_vm0, %v3245_v2, -inf }
 0x119   :  { %232 = vst.msk [vmem:[%s4922_s7 + $0x30] sm:$0xff] %vm225_vm0, %v3248_v4  ;;  %v2635_v5 = vpop.f32.mrb[8].mxu0  ;;  %v260_v32 = vsel %vm225_vm0, %v3248_v4, -inf }
 0x11a   :  { %v3261_v6 = vadd.f32 %v2635_v5, %v3186_v48  ;;  %v186_v7 = vpop.f32.mrb[9].mxu0 }
 0x11b   :  { %v3264_v8 = vadd.f32 %v3186_v48, %v186_v7 }
 0x11c   :  { %235 = vst.msk [vmem:[%s4922_s7 + $0x48] sm:$0xff] %vm225_vm0, %v3261_v6  ;;  %v269_v9 = vsel %vm225_vm0, %v3261_v6, -inf }
 0x11d   :  { %234 = vst.msk [vmem:[%s4922_s7 + $0x40] sm:$0xff] %vm225_vm0, %v3264_v8  ;;  %270 = vmax.xlane.f32.xlu1 %v269_v9  ;;  %v2638_v10 = vpop.f32.mrb[10].mxu0  ;;  %v266_v11 = vsel %vm225_vm0, %v3264_v8, -inf }
 0x11e   :  { %v3281_v12 = vadd.f32 %v2638_v10, %v3186_v48  ;;  %267 = vmax.xlane.f32.xlu0 %v266_v11  ;;  %v196_v14 = vpop.f32.mrb[11].mxu0 }
 0x11f   :  { %v3284_v15 = vadd.f32 %v3186_v48, %v196_v14 }
 0x120   :  { %237 = vst.msk [vmem:[%s4922_s7 + $0x58] sm:$0xff] %vm225_vm0, %v3281_v12  ;;  %v275_v18 = vsel %vm225_vm0, %v3281_v12, -inf }
 0x121   :  { %276 = vmax.xlane.f32.xlu1 %v275_v18  ;;  %236 = vst.msk [vmem:[%s4922_s7 + $0x50] sm:$0xff] %vm225_vm0, %v3284_v15  ;;  %v2641_v19 = vpop.f32.mrb[12].mxu0  ;;  %v272_v21 = vsel %vm225_vm0, %v3284_v15, -inf }
 0x122   :  { %255 = vmax.xlane.f32.xlu0 %v254_v16  ;;  %v3301_v20 = vadd.f32 %v2641_v19, %v3186_v48  ;;  %v206_v22 = vpop.f32.mrb[13].mxu0 }
 0x123   :  { %v3308_v26 = vadd.f32 %v3186_v48, %v206_v22 }
 0x124   :  { %239 = vst.msk [vmem:[%s4922_s7 + $0x68] sm:$0xff] %vm225_vm0, %v3301_v20  ;;  %v281_v28 = vsel %vm225_vm0, %v3301_v20, -inf }
 0x125   :  { %273 = vmax.xlane.f32.xlu1 %v272_v21  ;;  %238 = vst.msk [vmem:[%s4922_s7 + $0x60] sm:$0xff] %vm225_vm0, %v3308_v26  ;;  %v2644_v27 = vpop.f32.mrb[14].mxu0  ;;  %v278_v36 = vsel %vm225_vm0, %v3308_v26, -inf }
 0x126   :  { %258 = vmax.xlane.f32.xlu0 %v257_v25  ;;  %v3323_v30 = vadd.f32 %v2644_v27, %v3186_v48  ;;  %v216_v31 = vpop.f32.mrb[15].mxu0 }
 0x127   :  { %v3328_v35 = vadd.f32 %v3186_v48, %v216_v31 }
 0x128   :  { %241 = vst.msk [vmem:[%s4922_s7 + $0x78] sm:$0xff] %vm225_vm0, %v3323_v30  ;;  %v287_v40 = vsel %vm225_vm0, %v3323_v30, -inf }
 0x129   :  { %282 = vmax.xlane.f32.xlu1 %v281_v28  ;;  %240 = vst.msk [vmem:[%s4922_s7 + $0x70] sm:$0xff] %vm225_vm0, %v3328_v35  ;;  %v284_v39 = vsel %vm225_vm0, %v3328_v35, -inf }
 0x12a   :  { %261 = vmax.xlane.f32.xlu0 %v260_v32 }
 0x12d   :  { %279 = vmax.xlane.f32.xlu1 %v278_v36 }
 0x12e   :  { %264 = vmax.xlane.f32.xlu0 %v263_v38 }
 0x131   :  { %285 = vmax.xlane.f32.xlu1 %v284_v39 }
 0x135   :  { %288 = vmax.xlane.f32.xlu1 %v287_v40 }
 0x19a   :  { %v247_v41 = vpop.xlane.xlu1 %246 }
 0x19b   :  { %v291_v42 = vsub.f32 %v3189_v50, %v247_v41  ;;  %v244_v43 = vpop.xlane.xlu0 %243 }
 0x19c   :  { %v290_v44 = vsub.f32 %v3192_v52, %v244_v43 }
 0x19d   :  { %v308_v45 = vmul.f32 1.442695, %v291_v42 }
 0x19e   :  { %v306_v46 = vmul.f32 1.442695, %v290_v44 }
 0x19f   :  { %2865 = vpow2.f32 %v308_v45  ;;  %v253_v47 = vpop.xlane.xlu0 %252 }
 0x1a0   :  { %v293_v48 = vsub.f32 %v3209_v56, %v253_v47  ;;  %2867 = vpow2.f32 %v306_v46 }
 0x1a2   :  { %v312_v49 = vmul.f32 1.442695, %v293_v48 }
 0x1a3   :  { %v250_v51 = vpop.xlane.xlu0 %249 }
 0x1a4   :  { %v292_v53 = vsub.f32 %v3212_v58, %v250_v51  ;;  %2869 = vpow2.f32 %v312_v49 }
 0x1a6   :  { %v310_v54 = vmul.f32 1.442695, %v292_v53 }
 0x1a8   :  { %2871 = vpow2.f32 %v310_v54 }
 0x1a9   :  { %v3352_v55 = vpop.eup %2865 }
 0x1aa   :  { %v271_v50 = vpop.xlane.xlu1 %270  ;;  %v341_v52 = vsel %vm225_vm0, %v3352_v55, 0.0  ;;  %v3356_v57 = vpop.eup %2867 }
 0x1ab   :  { %v299_v59 = vsub.f32 %v3261_v6, %v271_v50  ;;  %342 = vadd.xlane.f32.xlu0 %v341_v52  ;;  %v268_v56 = vpop.xlane.xlu0 %267  ;;  %v338_v1 = vsel %vm225_vm0, %v3356_v57, 0.0 }
 0x1ac   :  { %v298_v60 = vsub.f32 %v3264_v8, %v268_v56 }
 0x1ad   :  { %v324_v62 = vmul.f32 1.442695, %v299_v59 }
 0x1ae   :  { %v322_v0 = vmul.f32 1.442695, %v298_v60  ;;  %v277_v58 = vpop.xlane.xlu1 %276  ;;  %v3362_v3 = vpop.eup %2869 }
 0x1af   :  { %2873 = vpow2.f32 %v324_v62  ;;  %v301_v5 = vsub.f32 %v3281_v12, %v277_v58  ;;  %339 = vadd.xlane.f32.xlu0 %v338_v1  ;;  %v256_v7 = vpop.xlane.xlu0 %255  ;;  %v347_v8 = vsel %vm225_vm0, %v3362_v3, 0.0 }
 0x1b0   :  { %2875 = vpow2.f32 %v322_v0  ;;  %v294_v6 = vsub.f32 %v3230_v63, %v256_v7 }
 0x1b1   :  { %v328_v9 = vmul.f32 1.442695, %v301_v5 }
 0x1b2   :  { %v274_v10 = vpop.xlane.xlu1 %273  ;;  %v3368_v11 = vpop.eup %2871  ;;  %v314_v19 = vmul.f32 1.442695, %v294_v6 }
 0x1b3   :  { %v300_v14 = vsub.f32 %v3284_v15, %v274_v10  ;;  %348 = vadd.xlane.f32.xlu0 %v347_v8  ;;  %v259_v16 = vpop.xlane.xlu0 %258  ;;  %2877 = vpow2.f32 %v328_v9  ;;  %v344_v63 = vsel %vm225_vm0, %v3368_v11, 0.0 }
 0x1b4   :  { %v295_v18 = vsub.f32 %v3227_v61, %v259_v16 }
 0x1b5   :  { %v326_v12 = vmul.f32 1.442695, %v300_v14 }
 0x1b6   :  { %v316_v21 = vmul.f32 1.442695, %v295_v18  ;;  %v283_v22 = vpop.xlane.xlu1 %282 }
 0x1b7   :  { %v303_v25 = vsub.f32 %v3301_v20, %v283_v22  ;;  %345 = vadd.xlane.f32.xlu0 %v344_v63  ;;  %v262_v27 = vpop.xlane.xlu0 %261 }
 0x1b8   :  { %2879 = vpow2.f32 %v316_v21  ;;  %v296_v28 = vsub.f32 %v3248_v4, %v262_v27 }
 0x1b9   :  { %v3376_v15 = vpop.eup %2873  ;;  %2881 = vpow2.f32 %v326_v12  ;;  %v332_v31 = vmul.f32 1.442695, %v303_v25 }
 0x1ba   :  { %2883 = vpow2.f32 %v314_v19  ;;  %v318_v61 = vmul.f32 1.442695, %v296_v28  ;;  %v280_v32 = vpop.xlane.xlu1 %279  ;;  %v365_v36 = vsel %vm225_vm0, %v3376_v15, 0.0  ;;  %v3380_v38 = vpop.eup %2875 }
 0x1bb   :  { %v302_v39 = vsub.f32 %v3308_v26, %v280_v32  ;;  %366 = vadd.xlane.f32.xlu1 %v365_v36  ;;  %v265_v20 = vpop.xlane.xlu0 %264  ;;  %2885 = vpow2.f32 %v332_v31  ;;  %v362_v43 = vsel %vm225_vm0, %v3380_v38, 0.0 }
 0x1bc   :  { %v297_v40 = vsub.f32 %v3245_v2, %v265_v20  ;;  %2887 = vpow2.f32 %v318_v61 }
 0x1bd   :  { %v330_v4 = vmul.f32 1.442695, %v302_v39  ;;  %v3386_v44 = vpop.eup %2877 }
 0x1be   :  { %v320_v41 = vmul.f32 1.442695, %v297_v40  ;;  %v286_v42 = vpop.xlane.xlu1 %285  ;;  %v371_v2 = vsel %vm225_vm0, %v3386_v44, 0.0 }
 0x1bf   :  { %v304_v45 = vsub.f32 %v3328_v35, %v286_v42  ;;  %363 = vadd.xlane.f32.xlu1 %v362_v43  ;;  %2889 = vpow2.f32 %v330_v4 }
 0x1c0   :  { %2891 = vpow2.f32 %v320_v41 }
 0x1c1   :  { %v334_v46 = vmul.f32 1.442695, %v304_v45 }
 0x1c2   :  { %v3389_v26 = vpop.eup %2879  ;;  %v289_v47 = vpop.xlane.xlu1 %288 }
 0x1c3   :  { %v3393_v48 = vpop.eup %2881  ;;  %v305_v49 = vsub.f32 %v3323_v30, %v289_v47  ;;  %372 = vadd.xlane.f32.xlu1 %v371_v2  ;;  %v353_v51 = vsel %vm225_vm0, %v3389_v26, 0.0  ;;  %2893 = vpow2.f32 %v334_v46 }
 0x1c4   :  { %v3398_v53 = vpop.eup %2883  ;;  %354 = vadd.xlane.f32.xlu0 %v353_v51  ;;  %v368_v54 = vsel %vm225_vm0, %v3393_v48, 0.0 }
 0x1c5   :  { %v336_v35 = vmul.f32 1.442695, %v305_v49  ;;  %v3402_v50 = vpop.eup %2885  ;;  %v350_v52 = vsel %vm225_vm0, %v3398_v53, 0.0 }
 0x1c6   :  { %v3406_v59 = vpop.eup %2887  ;;  %v377_v30 = vsel %vm225_vm0, %v3402_v50, 0.0 }
 0x1c7   :  { %369 = vadd.xlane.f32.xlu1 %v368_v54  ;;  %2895 = vpow2.f32 %v336_v35  ;;  %v356_v60 = vsel %vm225_vm0, %v3406_v59, 0.0 }
 0x1c8   :  { %351 = vadd.xlane.f32.xlu0 %v350_v52 }
 0x1c9   :  { %v3410_v56 = vpop.eup %2889 }
 0x1ca   :  { %v3414_v62 = vpop.eup %2891  ;;  %v374_v0 = vsel %vm225_vm0, %v3410_v56, 0.0 }
 0x1cb   :  { %378 = vadd.xlane.f32.xlu1 %v377_v30  ;;  %v359_v1 = vsel %vm225_vm0, %v3414_v62, 0.0 }
 0x1cc   :  { %357 = vadd.xlane.f32.xlu0 %v356_v60 }
 0x1cd   :  { %v3418_v58 = vpop.eup %2893 }
 0x1ce   :  { %v380_v5 = vsel %vm225_vm0, %v3418_v58, 0.0 }
 0x1cf   :  { %375 = vadd.xlane.f32.xlu1 %v374_v0 }
 0x1d0   :  { %360 = vadd.xlane.f32.xlu0 %v359_v1 }
 0x1d1   :  { %v3424_v7 = vpop.eup %2895 }
 0x1d2   :  { %v383_v9 = vsel %vm225_vm0, %v3424_v7, 0.0 }
 0x1d3   :  { %381 = vadd.xlane.f32.xlu1 %v380_v5 }
 0x1d7   :  { %384 = vadd.xlane.f32.xlu1 %v383_v9 }
 0x238   :  { %v343_v6 = vpop.xlane.xlu0 %342 }
 0x239   :  { %2897 = vrcp.f32 %v343_v6 }
 0x23c   :  { %v340_v10 = vpop.xlane.xlu0 %339 }
 0x23d   :  { %2899 = vrcp.f32 %v340_v10 }
 0x240   :  { %v349_v8 = vpop.xlane.xlu0 %348 }
 0x241   :  { %2901 = vrcp.f32 %v349_v8 }
 0x243   :  { %v2898_v14 = vpop.eup %2897 }
 0x244   :  { %v3429_v16 = vmul.f32 %v2898_v14, %v3352_v55  ;;  %v346_v18 = vpop.xlane.xlu0 %345 }
 0x245   :  { %2903 = vrcp.f32 %v346_v18 }
 0x246   :  { %v423_v12 = vsel %vm225_vm0, %v3429_v16, -inf }
 0x247   :  { %v2900_v19 = vpop.eup %2899  ;;  %424 = vmax.xlane.f32.xlu0 %v423_v12 }
 0x248   :  { %v3434_v21 = vmul.f32 %v2900_v19, %v3356_v57  ;;  %v367_v22 = vpop.xlane.xlu1 %366 }
 0x249   :  { %2905 = vrcp.f32 %v367_v22 }
 0x24a   :  { %v420_v63 = vsel %vm225_vm0, %v3434_v21, -inf }
 0x24b   :  { %v2902_v25 = vpop.eup %2901  ;;  %421 = vmax.xlane.f32.xlu0 %v420_v63 }
 0x24c   :  { %v3439_v55 = vmul.f32 %v2902_v25, %v3362_v3  ;;  %v364_v27 = vpop.xlane.xlu1 %363 }
 0x24d   :  { %2907 = vrcp.f32 %v364_v27  ;;  %v418_v27 = vlaneseq }
 0x24e   :  { %v429_v28 = vsel %vm225_vm0, %v3439_v55, -inf }
 0x24f   :  { %v2904_v31 = vpop.eup %2903  ;;  %430 = vmax.xlane.f32.xlu0 %v429_v28  ;;  %v3508_v28 = vand.u32 127, %v418_v27 }
 0x250   :  { %v3444_v57 = vmul.f32 %v2904_v31, %v3368_v11  ;;  %v373_v61 = vpop.xlane.xlu1 %372 }
 0x251   :  { %2909 = vrcp.f32 %v373_v61  ;;  %v355_v32 = vpop.xlane.xlu0 %354 }
 0x252   :  { %2911 = vrcp.f32 %v355_v32  ;;  %v426_v36 = vsel %vm225_vm0, %v3444_v57, -inf }
 0x253   :  { %v2906_v39 = vpop.eup %2905  ;;  %427 = vmax.xlane.f32.xlu0 %v426_v36 }
 0x254   :  { %v3449_v3 = vmul.f32 %v2906_v39, %v3376_v15  ;;  %v370_v20 = vpop.xlane.xlu1 %369 }
 0x255   :  { %2913 = vrcp.f32 %v370_v20  ;;  %v352_v40 = vpop.xlane.xlu0 %351 }
 0x256   :  { %2915 = vrcp.f32 %v352_v40  ;;  %v447_v11 = vsel %vm225_vm0, %v3449_v3, -inf }
 0x257   :  { %v2908_v4 = vpop.eup %2907  ;;  %448 = vmax.xlane.f32.xlu1 %v447_v11 }
 0x258   :  { %v3454_v41 = vmul.f32 %v2908_v4, %v3380_v38  ;;  %v379_v42 = vpop.xlane.xlu1 %378 }
 0x259   :  { %2917 = vrcp.f32 %v379_v42  ;;  %v358_v43 = vpop.xlane.xlu0 %357 }
 0x25a   :  { %2919 = vrcp.f32 %v358_v43  ;;  %v444_v15 = vsel %vm225_vm0, %v3454_v41, -inf }
 0x25b   :  { %v2910_v45 = vpop.eup %2909  ;;  %445 = vmax.xlane.f32.xlu1 %v444_v15 }
 0x25c   :  { %v2912_v46 = vpop.eup %2911  ;;  %v3459_v47 = vmul.f32 %v2910_v45, %v3386_v44  ;;  %v376_v2 = vpop.xlane.xlu1 %375 }
 0x25d   :  { %v3462_v49 = vmul.f32 %v2912_v46, %v3389_v26  ;;  %2921 = vrcp.f32 %v376_v2  ;;  %v361_v38 = vpop.xlane.xlu0 %360 }
 0x25e   :  { %2923 = vrcp.f32 %v361_v38  ;;  %v453_v51 = vsel %vm225_vm0, %v3459_v47, -inf }
 0x25f   :  { %4967 = vst [vmem:[#allocation10_spill] sm:$0xff] %v3462_v49  ;;  %v2914_v35 = vpop.eup %2913  ;;  %454 = vmax.xlane.f32.xlu1 %v453_v51  ;;  %v435_v54 = vsel %vm225_vm0, %v3462_v49, -inf }
 0x260   :  { %v2916_v52 = vpop.eup %2915  ;;  %v3469_v30 = vmul.f32 %v2914_v35, %v3393_v48  ;;  %v382_v44 = vpop.xlane.xlu1 %381  ;;  %436 = vmax.xlane.f32.xlu0 %v435_v54 }
 0x261   :  { %v3472_v26 = vmul.f32 %v2916_v52, %v3398_v53  ;;  %2925 = vrcp.f32 %v382_v44 }
 0x262   :  { %4968 = vst [vmem:[#allocation11_spill] sm:$0xff] %v3469_v30  ;;  %v450_v60 = vsel %vm225_vm0, %v3469_v30, -inf }
 0x263   :  { %4969 = vst [vmem:[#allocation12_spill] sm:$0xff] %v3472_v26  ;;  %v2918_v0 = vpop.eup %2917  ;;  %451 = vmax.xlane.f32.xlu1 %v450_v60  ;;  %v432_v1 = vsel %vm225_vm0, %v3472_v26, -inf }
 0x264   :  { %v2920_v5 = vpop.eup %2919  ;;  %v3479_v9 = vmul.f32 %v2918_v0, %v3402_v50  ;;  %v385_v48 = vpop.xlane.xlu1 %384  ;;  %433 = vmax.xlane.f32.xlu0 %v432_v1 }
 0x265   :  { %v3482_v6 = vmul.f32 %v2920_v5, %v3406_v59  ;;  %2927 = vrcp.f32 %v385_v48 }
 0x266   :  { %4970 = vst [vmem:[#allocation13_spill] sm:$0xff] %v3479_v9  ;;  %v459_v53 = vsel %vm225_vm0, %v3479_v9, -inf }
 0x267   :  { %4971 = vst [vmem:[#allocation14_spill] sm:$0xff] %v3482_v6  ;;  %v2922_v10 = vpop.eup %2921  ;;  %460 = vmax.xlane.f32.xlu1 %v459_v53  ;;  %v438_v8 = vsel %vm225_vm0, %v3482_v6, -inf }
 0x268   :  { %v2924_v14 = vpop.eup %2923  ;;  %v3489_v18 = vmul.f32 %v2922_v10, %v3410_v56  ;;  %439 = vmax.xlane.f32.xlu0 %v438_v8 }
 0x269   :  { %v3492_v50 = vmul.f32 %v2924_v14, %v3414_v62 }
 0x26a   :  { %4972 = vst [vmem:[#allocation15_spill] sm:$0xff] %v3489_v18  ;;  %v456_v59 = vsel %vm225_vm0, %v3489_v18, -inf }
 0x26b   :  { %4973 = vst [vmem:[#allocation16_spill] sm:$0xff] %v3492_v50  ;;  %v2926_v12 = vpop.eup %2925  ;;  %457 = vmax.xlane.f32.xlu1 %v456_v59  ;;  %v441_v19 = vsel %vm225_vm0, %v3492_v50, -inf }
 0x26c   :  { %v3499_v22 = vmul.f32 %v2926_v12, %v3418_v58  ;;  %442 = vmax.xlane.f32.xlu0 %v441_v19 }
 0x26e   :  { %4974 = vst [vmem:[#allocation17_spill] sm:$0xff] %v3499_v22  ;;  %v462_v56 = vsel %vm225_vm0, %v3499_v22, -inf }
 0x26f   :  { %v2928_v63 = vpop.eup %2927  ;;  %463 = vmax.xlane.f32.xlu1 %v462_v56 }
 0x270   :  { %v3504_v62 = vmul.f32 %v2928_v63, %v3424_v7 }
 0x272   :  { %4975 = vst [vmem:[#allocation18_spill] sm:$0xff] %v3504_v62  ;;  %v465_v25 = vsel %vm225_vm0, %v3504_v62, -inf }
 0x273   :  { %466 = vmax.xlane.f32.xlu1 %v465_v25 }
 0x2d4   :  { %v425_v31 = vpop.xlane.xlu0 %424 }
 0x2d5   :  { %vm469_vm1 = vcmp.eq.f32.partialorder %v3429_v16, %v425_v31 }
 0x2d6   :  { %v485_v58 = vsel %vm469_vm1, %v3508_v28, 4 }
 0x2d7   :  { %v3513_v61 = vsel %vm225_vm0, %v485_v58, 2147483647 }
 0x2d8   :  { %v422_v32 = vpop.xlane.xlu0 %421  ;;  %v517_v36 = vshra.s32 %v3513_v61, 16 }
 0x2d9   :  { %vm468_vm2 = vcmp.eq.f32.partialorder %v3434_v21, %v422_v32 }
 0x2da   :  { %v484_v7 = vsel %vm468_vm2, %v3508_v28, 4  ;;  %v3518_v39 = vcvt.s32.f32 %v517_v36 }
 0x2db   :  { %v3521_v20 = vsel %vm225_vm0, %v484_v7, 2147483647 }
 0x2dc   :  { %520 = vmin.xlane.f32.xlu0 %v3518_v39  ;;  %v431_v40 = vpop.xlane.xlu0 %430  ;;  %v502_v11 = vshra.s32 %v3521_v20, 16 }
 0x2dd   :  { %vm471_vm3 = vcmp.eq.f32.partialorder %v3439_v55, %v431_v40 }
 0x2de   :  { %v487_v4 = vsel %vm471_vm3, %v3508_v28, 4  ;;  %v3527_v42 = vcvt.s32.f32 %v502_v11 }
 0x2df   :  { %v3530_v43 = vsel %vm225_vm0, %v487_v4, 2147483647 }
 0x2e0   :  { %505 = vmin.xlane.f32.xlu0 %v3527_v42  ;;  %v428_v15 = vpop.xlane.xlu0 %427  ;;  %v547_v45 = vshra.s32 %v3530_v43, 16 }
 0x2e1   :  { %vm470_vm4 = vcmp.eq.f32.partialorder %v3444_v57, %v428_v15 }
 0x2e2   :  { %v486_v46 = vsel %vm470_vm4, %v3508_v28, 4  ;;  %v3536_v2 = vcvt.s32.f32 %v547_v45 }
 0x2e3   :  { %v3539_v38 = vsel %vm225_vm0, %v486_v46, 2147483647 }
 0x2e4   :  { %v449_v51 = vpop.xlane.xlu1 %448  ;;  %550 = vmin.xlane.f32.xlu0 %v3536_v2  ;;  %v532_v35 = vshra.s32 %v3539_v38, 16 }
 0x2e5   :  { %vm477_vm5 = vcmp.eq.f32.partialorder %v3449_v3, %v449_v51 }
 0x2e6   :  { %v493_v54 = vsel %vm477_vm5, %v3508_v28, 4  ;;  %v3545_v52 = vcvt.s32.f32 %v532_v35 }
 0x2e7   :  { %v3548_v44 = vsel %vm225_vm0, %v493_v54, 2147483647 }
 0x2e8   :  { %v446_v60 = vpop.xlane.xlu1 %445  ;;  %535 = vmin.xlane.f32.xlu0 %v3545_v52  ;;  %v637_v0 = vshra.s32 %v3548_v44, 16 }
 0x2e9   :  { %vm476_vm6 = vcmp.eq.f32.partialorder %v3454_v41, %v446_v60 }
 0x2ea   :  { %v492_v1 = vsel %vm476_vm6, %v3508_v28, 4  ;;  %v3554_v5 = vcvt.s32.f32 %v637_v0 }
 0x2eb   :  { %v3557_v48 = vsel %vm225_vm0, %v492_v1, 2147483647 }
 0x2ec   :  { %640 = vmin.xlane.f32.xlu1 %v3554_v5  ;;  %v455_v53 = vpop.xlane.xlu1 %454  ;;  %v622_v10 = vshra.s32 %v3557_v48, 16 }
 0x2ed   :  { %vm479_vm7 = vcmp.eq.f32.partialorder %v3459_v47, %v455_v53  ;;  %v437_v8 = vpop.xlane.xlu0 %436 }
 0x2ee   :  { %v495_v14 = vsel %vm479_vm7, %v3508_v28, 4  ;;  %vm473_vm8 = vcmp.eq.f32.partialorder %v3462_v49, %v437_v8  ;;  %v3564_v59 = vcvt.s32.f32 %v622_v10 }
 0x2ef   :  { %v489_v12 = vsel %vm473_vm8, %v3508_v28, 4  ;;  %v3568_v19 = vsel %vm225_vm0, %v495_v14, 2147483647 }
 0x2f0   :  { %625 = vmin.xlane.f32.xlu1 %v3564_v59  ;;  %v452_v56 = vpop.xlane.xlu1 %451  ;;  %v667_v63 = vshra.s32 %v3568_v19, 16  ;;  %v3573_v25 = vsel %vm225_vm0, %v489_v12, 2147483647 }
 0x2f1   :  { %vm478_vm9 = vcmp.eq.f32.partialorder %v3469_v30, %v452_v56  ;;  %v434_v27 = vpop.xlane.xlu0 %433  ;;  %v577_v31 = vshra.s32 %v3573_v25, 16 }
 0x2f2   :  { %v494_v58 = vsel %vm478_vm9, %v3508_v28, 4  ;;  %vm472_vm10 = vcmp.eq.f32.partialorder %v3472_v26, %v434_v27  ;;  %v3579_v32 = vcvt.s32.f32 %v667_v63 }
 0x2f3   :  { %v488_v36 = vsel %vm472_vm10, %v3508_v28, 4  ;;  %v3582_v7 = vcvt.s32.f32 %v577_v31  ;;  %v3585_v40 = vsel %vm225_vm0, %v494_v58, 2147483647 }
 0x2f4   :  { %670 = vmin.xlane.f32.xlu1 %v3579_v32  ;;  %v461_v11 = vpop.xlane.xlu1 %460  ;;  %v652_v4 = vshra.s32 %v3585_v40, 16  ;;  %v3590_v15 = vsel %vm225_vm0, %v488_v36, 2147483647 }
 0x2f5   :  { %vm481_vm11 = vcmp.eq.f32.partialorder %v3479_v9, %v461_v11  ;;  %580 = vmin.xlane.f32.xlu0 %v3582_v7  ;;  %v440_v45 = vpop.xlane.xlu0 %439  ;;  %v562_v46 = vshra.s32 %v3590_v15, 16 }
 0x2f6   :  { %v497_v51 = vsel %vm481_vm11, %v3508_v28, 4  ;;  %vm474_vm12 = vcmp.eq.f32.partialorder %v3482_v6, %v440_v45  ;;  %v3597_v35 = vcvt.s32.f32 %v652_v4 }
 0x2f7   :  { %v490_v54 = vsel %vm474_vm12, %v3508_v28, 4  ;;  %v3600_v60 = vcvt.s32.f32 %v562_v46  ;;  %v3603_v0 = vsel %vm225_vm0, %v497_v51, 2147483647 }
 0x2f8   :  { %655 = vmin.xlane.f32.xlu1 %v3597_v35  ;;  %v458_v1 = vpop.xlane.xlu1 %457  ;;  %v697_v53 = vshra.s32 %v3603_v0, 16  ;;  %v3608_v10 = vsel %vm225_vm0, %v490_v54, 2147483647 }
 0x2f9   :  { %vm480_vm13 = vcmp.eq.f32.partialorder %v3489_v18, %v458_v1  ;;  %565 = vmin.xlane.f32.xlu0 %v3600_v60  ;;  %v443_v8 = vpop.xlane.xlu0 %442  ;;  %v592_v14 = vshra.s32 %v3608_v10, 16 }
 0x2fa   :  { %v496_v12 = vsel %vm480_vm13, %v3508_v28, 4  ;;  %vm475_vm14 = vcmp.eq.f32.partialorder %v3492_v50, %v443_v8  ;;  %v3615_v56 = vcvt.s32.f32 %v697_v53 }
 0x2fb   :  { %v491_v63 = vsel %vm475_vm14, %v3508_v28, 4  ;;  %v3618_v27 = vcvt.s32.f32 %v592_v14  ;;  %v3621_v31 = vsel %vm225_vm0, %v496_v12, 2147483647 }
 0x2fc   :  { %700 = vmin.xlane.f32.xlu1 %v3615_v56  ;;  %v464_v58 = vpop.xlane.xlu1 %463  ;;  %v682_v36 = vshra.s32 %v3621_v31, 16  ;;  %v3626_v11 = vsel %vm225_vm0, %v491_v63, 2147483647 }
 0x2fd   :  { %vm482_vm15 = vcmp.eq.f32.partialorder %v3499_v22, %v464_v58  ;;  %595 = vmin.xlane.f32.xlu0 %v3618_v27  ;;  %v607_v4 = vshra.s32 %v3626_v11, 16 }
 0x2fe   :  { %v498_v45 = vsel %vm482_vm15, %v3508_v28, 4  ;;  %v3632_v46 = vcvt.s32.f32 %v682_v36  ;;  %v516_v36 = vand.u32 65535, %v3513_v61 }
 0x2ff   :  { %v3634_v51 = vcvt.s32.f32 %v607_v4  ;;  %v3637_v54 = vsel %vm225_vm0, %v498_v45, 2147483647 }
 0x300   :  { %685 = vmin.xlane.f32.xlu1 %v3632_v46  ;;  %v467_v1 = vpop.xlane.xlu1 %466  ;;  %v712_v53 = vshra.s32 %v3637_v54, 16  ;;  %v518_v45 = vcvt.s32.f32 %v516_v36 }
 0x301   :  { %vm483_vm1 = vcmp.eq.f32.partialorder %v3504_v62, %v467_v1  ;;  %610 = vmin.xlane.f32.xlu0 %v3634_v51  ;;  %v501_v1 = vand.u32 65535, %v3521_v20  ;;  %v531_v20 = vand.u32 65535, %v3539_v38  ;;  %v621_v38 = vand.u32 65535, %v3557_v48 }
 0x302   :  { %v499_v8 = vsel %vm483_vm1, %v3508_v28, 4  ;;  %v3644_v14 = vcvt.s32.f32 %v712_v53 }
 0x303   :  { %v3647_v12 = vsel %vm225_vm0, %v499_v8, 2147483647  ;;  %v503_v37 = vcvt.s32.f32 %v501_v1  ;;  %v533_v1 = vcvt.s32.f32 %v531_v20 }
 0x304   :  { %715 = vmin.xlane.f32.xlu1 %v3644_v14  ;;  %v727_v63 = vshra.s32 %v3647_v12, 16 }
 0x306   :  { %v3651_v58 = vcvt.s32.f32 %v727_v63  ;;  %v546_v63 = vand.u32 65535, %v3530_v43  ;;  %v636_v43 = vand.u32 65535, %v3548_v44  ;;  %v666_v44 = vand.u32 65535, %v3568_v19 }
 0x307   :  { %v561_v19 = vand.u32 65535, %v3590_v15  ;;  %v591_v15 = vand.u32 65535, %v3608_v10  ;;  %v606_v10 = vand.u32 65535, %v3626_v11 }
 0x308   :  { %730 = vmin.xlane.f32.xlu1 %v3651_v58  ;;  %v548_v36 = vcvt.s32.f32 %v546_v63  ;;  %v623_v63 = vcvt.s32.f32 %v621_v38  ;;  %v668_v48 = vcvt.s32.f32 %v666_v44 }
 0x369   :  { %v3655_v4 = vpop.xlane.xlu0 %520 }
 0x36a   :  { %vm522_vm2 = vcmp.eq.f32.partialorder %v3518_v39, %v3655_v4 }
 0x36b   :  { %v523_v53 = vsel %vm522_vm2, %v518_v45, inf }
 0x36c   :  { %524 = vmin.xlane.f32.xlu0 %v523_v53 }
 0x36d   :  { %v3660_v8 = vpop.xlane.xlu0 %505 }
 0x36e   :  { %vm507_vm3 = vcmp.eq.f32.partialorder %v3527_v42, %v3660_v8  ;;  %v638_v42 = vcvt.s32.f32 %v636_v43 }
 0x36f   :  { %v508_v34 = vsel %vm507_vm3, %v503_v37, inf }
 0x370   :  { %509 = vmin.xlane.f32.xlu0 %v508_v34 }
 0x371   :  { %v3665_v61 = vpop.xlane.xlu0 %550 }
 0x372   :  { %vm552_vm4 = vcmp.eq.f32.partialorder %v3536_v2, %v3665_v61 }
 0x373   :  { %v553_v39 = vsel %vm552_vm4, %v548_v36, inf }
 0x374   :  { %554 = vmin.xlane.f32.xlu0 %v553_v39  ;;  %v651_v39 = vand.u32 65535, %v3585_v40  ;;  %v696_v40 = vand.u32 65535, %v3603_v0  ;;  %v681_v0 = vand.u32 65535, %v3621_v31  ;;  %v711_v31 = vand.u32 65535, %v3637_v54 }
 0x375   :  { %v3670_v45 = vpop.xlane.xlu0 %535 }
 0x376   :  { %vm537_vm5 = vcmp.eq.f32.partialorder %v3545_v52, %v3670_v45  ;;  %v576_v52 = vand.u32 65535, %v3573_v25 }
 0x377   :  { %v538_v37 = vsel %vm537_vm5, %v533_v1, inf }
 0x378   :  { %539 = vmin.xlane.f32.xlu0 %v538_v37  ;;  %v578_v1 = vcvt.s32.f32 %v576_v52  ;;  %v653_v37 = vcvt.s32.f32 %v651_v39 }
 0x379   :  { %v3675_v34 = vpop.xlane.xlu1 %640 }
 0x37a   :  { %vm642_vm6 = vcmp.eq.f32.partialorder %v3554_v5, %v3675_v34 }
 0x37b   :  { %v643_v2 = vsel %vm642_vm6, %v638_v42, inf }
 0x37c   :  { %644 = vmin.xlane.f32.xlu1 %v643_v2 }
 0x37d   :  { %v3680_v53 = vpop.xlane.xlu1 %625 }
 0x37e   :  { %vm627_vm7 = vcmp.eq.f32.partialorder %v3564_v59, %v3680_v53 }
 0x37f   :  { %v628_v36 = vsel %vm627_vm7, %v623_v63, inf  ;;  %v698_v63 = vcvt.s32.f32 %v696_v40 }
 0x380   :  { %629 = vmin.xlane.f32.xlu1 %v628_v36 }
 0x381   :  { %v3686_v20 = vpop.xlane.xlu1 %670 }
 0x382   :  { %v3689_v5 = vpop.xlane.xlu0 %580  ;;  %vm672_vm8 = vcmp.eq.f32.partialorder %v3579_v32, %v3686_v20  ;;  %v563_v32 = vcvt.s32.f32 %v561_v19  ;;  %v713_v19 = vcvt.s32.f32 %v711_v31 }
 0x383   :  { %v673_v43 = vsel %vm672_vm8, %v668_v48, inf  ;;  %vm582_vm9 = vcmp.eq.f32.partialorder %v3582_v7, %v3689_v5  ;;  %v683_v48 = vcvt.s32.f32 %v681_v0 }
 0x384   :  { %674 = vmin.xlane.f32.xlu1 %v673_v43  ;;  %v583_v59 = vsel %vm582_vm9, %v578_v1, inf  ;;  %v726_v43 = vand.u32 65535, %v3647_v12 }
 0x385   :  { %v3696_v25 = vpop.xlane.xlu1 %655  ;;  %584 = vmin.xlane.f32.xlu0 %v583_v59 }
 0x386   :  { %v3699_v42 = vpop.xlane.xlu0 %565  ;;  %vm657_vm10 = vcmp.eq.f32.partialorder %v3597_v35, %v3696_v25  ;;  %v593_v35 = vcvt.s32.f32 %v591_v15  ;;  %v512_v15 = vcvt.f32.s32 %v3660_v8 }
 0x387   :  { %v658_v38 = vsel %vm657_vm10, %v653_v37, inf  ;;  %vm567_vm11 = vcmp.eq.f32.partialorder %v3600_v60, %v3699_v42  ;;  %v527_v37 = vcvt.f32.s32 %v3655_v4 }
 0x388   :  { %659 = vmin.xlane.f32.xlu1 %v658_v38  ;;  %v568_v7 = vsel %vm567_vm11, %v563_v32, inf }
 0x389   :  { %v3706_v2 = vpop.xlane.xlu1 %700  ;;  %569 = vmin.xlane.f32.xlu0 %v568_v7  ;;  %v528_v32 = vshll.u32 %v527_v37, 16  ;;  %v513_v7 = vshll.u32 %v512_v15, 16 }
 0x38a   :  { %v3709_v44 = vpop.xlane.xlu0 %595  ;;  %vm702_vm12 = vcmp.eq.f32.partialorder %v3615_v56, %v3706_v2  ;;  %v608_v56 = vcvt.s32.f32 %v606_v10 }
 0x38b   :  { %v703_v52 = vsel %vm702_vm12, %v698_v63, inf  ;;  %vm597_vm13 = vcmp.eq.f32.partialorder %v3618_v27, %v3709_v44  ;;  %v557_v63 = vcvt.f32.s32 %v3665_v61  ;;  %v542_v61 = vcvt.f32.s32 %v3670_v45 }
 0x38c   :  { %704 = vmin.xlane.f32.xlu1 %v703_v52  ;;  %v598_v60 = vsel %vm597_vm13, %v593_v35, inf  ;;  %v647_v45 = vcvt.f32.s32 %v3675_v34  ;;  %v632_v34 = vcvt.f32.s32 %v3680_v53  ;;  %v677_v53 = vcvt.f32.s32 %v3686_v20 }
 0x38d   :  { %v3716_v36 = vpop.xlane.xlu1 %685  ;;  %599 = vmin.xlane.f32.xlu0 %v598_v60  ;;  %v558_v10 = vshll.u32 %v557_v63, 16  ;;  %v587_v63 = vcvt.f32.s32 %v3689_v5 }
 0x38e   :  { %v3719_v39 = vpop.xlane.xlu0 %610  ;;  %vm687_vm14 = vcmp.eq.f32.partialorder %v3632_v46, %v3716_v36  ;;  %v728_v46 = vcvt.s32.f32 %v726_v43  ;;  %v678_v20 = vshll.u32 %v677_v53, 16 }
 0x38f   :  { %v688_v1 = vsel %vm687_vm14, %v683_v48, inf  ;;  %vm612_vm15 = vcmp.eq.f32.partialorder %v3634_v51, %v3719_v39  ;;  %v588_v5 = vshll.u32 %v587_v63, 16 }
 0x390   :  { %689 = vmin.xlane.f32.xlu1 %v688_v1  ;;  %v613_v27 = vsel %vm612_vm15, %v608_v56, inf  ;;  %v543_v1 = vshll.u32 %v542_v61, 16  ;;  %v662_v61 = vcvt.f32.s32 %v3696_v25 }
 0x391   :  { %v3725_v11 = vpop.xlane.xlu1 %715  ;;  %614 = vmin.xlane.f32.xlu0 %v613_v27 }
 0x392   :  { %vm717_vm1 = vcmp.eq.f32.partialorder %v3644_v14, %v3725_v11 }
 0x393   :  { %v718_v54 = vsel %vm717_vm1, %v713_v19, inf }
 0x394   :  { %719 = vmin.xlane.f32.xlu1 %v718_v54 }
 0x395   :  { %v3730_v59 = vpop.xlane.xlu1 %730 }
 0x396   :  { %vm732_vm2 = vcmp.eq.f32.partialorder %v3651_v58, %v3730_v59 }
 0x397   :  { %v733_v51 = vsel %vm732_vm2, %v728_v46, inf }
 0x398   :  { %734 = vmin.xlane.f32.xlu1 %v733_v51  ;;  %v648_v51 = vshll.u32 %v647_v45, 16 }
 0x3f9   :  { %v525_v40 = vpop.xlane.xlu0 %524 }
 0x3fa   :  { %v526_v12 = vcvt.f32.s32 %v525_v40 }
 0x3fc   :  { %v3736_v38 = vadd.s32 %v528_v32, %v526_v12 }
 0x3fd   :  { %v510_v14 = vpop.xlane.xlu0 %509 }
 0x3fe   :  { %v511_v0 = vcvt.f32.s32 %v510_v14  ;;  %vm741_vm3 = vcmp.eq.s32.totalorder %v3508_v28, %v3736_v38  ;;  %v633_v14 = vshll.u32 %v632_v34, 16  ;;  %v663_v34 = vshll.u32 %v662_v61, 16 }
 0x3ff   :  { %v3745_v58 = vsel %vm741_vm3, -inf, %v3429_v16 }
 0x400   :  { %v3747_v4 = vadd.s32 %v513_v7, %v511_v0  ;;  %v791_v8 = vsel %vm225_vm0, %v3745_v58, -inf }
 0x401   :  { %792 = vmax.xlane.f32.xlu0 %v791_v8  ;;  %v555_v35 = vpop.xlane.xlu0 %554 }
 0x402   :  { %v556_v52 = vcvt.f32.s32 %v555_v35  ;;  %vm740_vm4 = vcmp.eq.s32.totalorder %v3508_v28, %v3747_v4 }
 0x403   :  { %v3758_v60 = vsel %vm740_vm4, -inf, %v3434_v21  ;;  %v756_v38 = vsel %vm740_vm4, %v3434_v21, 0.0 }
 0x404   :  { %v3760_v48 = vadd.s32 %v558_v10, %v556_v52  ;;  %v788_v31 = vsel %vm225_vm0, %v3758_v60, -inf }
 0x405   :  { %789 = vmax.xlane.f32.xlu0 %v788_v31  ;;  %v540_v56 = vpop.xlane.xlu0 %539 }
 0x406   :  { %v541_v27 = vcvt.f32.s32 %v540_v56  ;;  %vm743_vm5 = vcmp.eq.s32.totalorder %v3508_v28, %v3760_v48  ;;  %v572_v56 = vcvt.f32.s32 %v3699_v42  ;;  %v602_v42 = vcvt.f32.s32 %v3709_v44 }
 0x407   :  { %v3771_v19 = vsel %vm743_vm5, -inf, %v3439_v55  ;;  %v759_v4 = vsel %vm743_vm5, %v3439_v55, 0.0 }
 0x408   :  { %v3773_v43 = vadd.s32 %v543_v1, %v541_v27  ;;  %v797_v54 = vsel %vm225_vm0, %v3771_v19, -inf  ;;  %v603_v61 = vshll.u32 %v602_v42, 16 }
 0x409   :  { %v645_v46 = vpop.xlane.xlu1 %644  ;;  %798 = vmax.xlane.f32.xlu0 %v797_v54  ;;  %v707_v54 = vcvt.f32.s32 %v3706_v2 }
 0x40a   :  { %v646_v37 = vcvt.f32.s32 %v645_v46  ;;  %vm742_vm6 = vcmp.eq.s32.totalorder %v3508_v28, %v3773_v43 }
 0x40b   :  { %v3784_v40 = vsel %vm742_vm6, -inf, %v3444_v57  ;;  %v708_v63 = vshll.u32 %v707_v54, 16  ;;  %v758_v48 = vsel %vm742_vm6, %v3444_v57, 0.0 }
 0x40c   :  { %v3786_v32 = vadd.s32 %v648_v51, %v646_v37  ;;  %v794_v15 = vsel %vm225_vm0, %v3784_v40, -inf }
 0x40d   :  { %v630_v12 = vpop.xlane.xlu1 %629  ;;  %795 = vmax.xlane.f32.xlu0 %v794_v15 }
 0x40e   :  { %v631_v7 = vcvt.f32.s32 %v630_v12  ;;  %vm749_vm7 = vcmp.eq.s32.totalorder %v3508_v28, %v3786_v32  ;;  %v573_v12 = vshll.u32 %v572_v56, 16  ;;  %v617_v56 = vcvt.f32.s32 %v3719_v39 }
 0x40f   :  { %v3798_v0 = vsel %vm749_vm7, -inf, %v3449_v3  ;;  %v765_v43 = vsel %vm749_vm7, %v3449_v3, 0.0 }
 0x410   :  { %v3800_v8 = vadd.s32 %v633_v14, %v631_v7  ;;  %v815_v35 = vsel %vm225_vm0, %v3798_v0, -inf }
 0x411   :  { %816 = vmax.xlane.f32.xlu1 %v815_v35  ;;  %v675_v10 = vpop.xlane.xlu1 %674 }
 0x412   :  { %v676_v52 = vcvt.f32.s32 %v675_v10  ;;  %v585_v31 = vpop.xlane.xlu0 %584  ;;  %vm748_vm8 = vcmp.eq.s32.totalorder %v3508_v28, %v3800_v8  ;;  %v2230_v8 = vld [vmem:[%s4920_s5] sm:$0xf] }
 0x413   :  { %v586_v1 = vcvt.f32.s32 %v585_v31  ;;  %v3812_v45 = vsel %vm748_vm8, -inf, %v3454_v41  ;;  %v764_v32 = vsel %vm748_vm8, %v3454_v41, 0.0 }
 0x414   :  { %v3814_v27 = vadd.s32 %v678_v20, %v676_v52  ;;  %v812_v25 = vsel %vm225_vm0, %v3812_v45, -inf  ;;  %v692_v52 = vcvt.f32.s32 %v3716_v36 }
 0x415   :  { %v3819_v46 = vadd.s32 %v588_v5, %v586_v1  ;;  %813 = vmax.xlane.f32.xlu1 %v812_v25  ;;  %v660_v51 = vpop.xlane.xlu1 %659 }
 0x416   :  { %4976 = vst [vmem:[#allocation19_spill] sm:$0xff] %v3814_v27  ;;  %v661_v37 = vcvt.f32.s32 %v660_v51  ;;  %v570_v15 = vpop.xlane.xlu0 %569  ;;  %vm751_vm9 = vcmp.eq.s32.totalorder %v3508_v28, %v3814_v27 }
 0x417   :  { %4977 = vst [vmem:[#allocation20_spill] sm:$0xff] %v3819_v46  ;;  %v571_v14 = vcvt.f32.s32 %v570_v15  ;;  %v3828_v53 = vsel %vm751_vm9, -inf, %v3459_v47  ;;  %vm745_vm10 = vcmp.eq.s32.totalorder %v3508_v28, %v3819_v46  ;;  %v722_v15 = vcvt.f32.s32 %v3725_v11 }
 0x418   :  { %v3832_v2 = vadd.s32 %v663_v34, %v661_v37  ;;  %v821_v44 = vsel %vm225_vm0, %v3828_v53, -inf  ;;  %v3840_v7 = vsel %vm745_vm10, -inf, %v3462_v49  ;;  %v693_v37 = vshll.u32 %v692_v52, 16 }
 0x419   :  { %v3842_v35 = vadd.s32 %v573_v12, %v571_v14  ;;  %822 = vmax.xlane.f32.xlu1 %v821_v44  ;;  %v705_v10 = vpop.xlane.xlu1 %704  ;;  %v803_v20 = vsel %vm225_vm0, %v3840_v7, -inf  ;;  %v618_v44 = vshll.u32 %v617_v56, 16  ;;  %v723_v56 = vshll.u32 %v722_v15, 16 }
 0x41a   :  { %4978 = vst [vmem:[#allocation21_spill] sm:$0xff] %v3832_v2  ;;  %v706_v31 = vcvt.f32.s32 %v705_v10  ;;  %804 = vmax.xlane.f32.xlu0 %v803_v20  ;;  %v600_v5 = vpop.xlane.xlu0 %599  ;;  %vm750_vm11 = vcmp.eq.s32.totalorder %v3508_v28, %v3832_v2  ;;  %v2817_v2 = vld [vmem:[#allocation2 + $0x50] ss:$20 sps:$4 sm:$0xff]  }
 0x41b   :  { %4979 = vst [vmem:[#allocation22_spill] sm:$0xff] %v3842_v35  ;;  %v601_v1 = vcvt.f32.s32 %v600_v5  ;;  %v3854_v25 = vsel %vm750_vm11, -inf, %v3469_v30  ;;  %vm744_vm12 = vcmp.eq.s32.totalorder %v3508_v28, %v3842_v35  ;;  %v2809_v35 = vld [vmem:[#allocation2 + $0x4] ss:$20 sps:$4 sm:$0xff]  }
 0x41c   :  { %v3858_v54 = vadd.s32 %v708_v63, %v706_v31  ;;  %v818_v36 = vsel %vm225_vm0, %v3854_v25, -inf  ;;  %v3866_v39 = vsel %vm744_vm12, -inf, %v3472_v26  ;;  %v2811_v26 = vld [vmem:[#allocation2] ss:$20 sps:$4 sm:$0xff]   ;;  %1484 = vmatprep.subr.bf16.mxu1 %v2809_v35  ;;  %v2820_v30 = vld [vmem:[#allocation2 + $0x78] ss:$20 sps:$4 sm:$0xff]  }
 0x41d   :  { %v3868_v51 = vadd.s32 %v603_v61, %v601_v1  ;;  %819 = vmax.xlane.f32.xlu1 %v818_v36  ;;  %v690_v34 = vpop.xlane.xlu1 %689  ;;  %v800_v42 = vsel %vm225_vm0, %v3866_v39, -inf  ;;  %v737_v1 = vcvt.f32.s32 %v3730_v59  ;;  %1485 = vmatpush1.bf16.msra.mxu1 %v2811_v26 }
 0x41e   :  { %4980 = vst [vmem:[#allocation23_spill] sm:$0xff] %v3858_v54  ;;  %v691_v12 = vcvt.f32.s32 %v690_v34  ;;  %801 = vmax.xlane.f32.xlu0 %v800_v42  ;;  %v615_v14 = vpop.xlane.xlu0 %614  ;;  %vm753_vm13 = vcmp.eq.s32.totalorder %v3508_v28, %v3858_v54 }
 0x41f   :  { %4981 = vst [vmem:[#allocation24_spill] sm:$0xff] %v3868_v51  ;;  %v616_v63 = vcvt.f32.s32 %v615_v14  ;;  %v3879_v10 = vsel %vm753_vm13, -inf, %v3479_v9  ;;  %vm746_vm14 = vcmp.eq.s32.totalorder %v3508_v28, %v3868_v51  ;;  %v738_v14 = vshll.u32 %v737_v1, 16 }
 0x420   :  { %v3883_v20 = vadd.s32 %v693_v37, %v691_v12  ;;  %v827_v11 = vsel %vm225_vm0, %v3879_v10, -inf  ;;  %v3891_v61 = vsel %vm746_vm14, -inf, %v3482_v6 }
 0x421   :  { %v3893_v52 = vadd.s32 %v618_v44, %v616_v63  ;;  %828 = vmax.xlane.f32.xlu1 %v827_v11  ;;  %v720_v31 = vpop.xlane.xlu1 %719  ;;  %v806_v5 = vsel %vm225_vm0, %v3891_v61, -inf }
 0x422   :  { %4982 = vst [vmem:[#allocation25_spill] sm:$0xff] %v3883_v20  ;;  %v721_v36 = vcvt.f32.s32 %v720_v31  ;;  %807 = vmax.xlane.f32.xlu0 %v806_v5  ;;  %vm4927_vm15 = vcmp.eq.s32.totalorder %v3508_v28, %v3883_v20 }
 0x423   :  { %4983 = vst [vmem:[#allocation26_spill] sm:$0xff] %v3893_v52  ;;  %v3904_v34 = vsel %vm4927_vm15, -inf, %v3489_v18  ;;  %vm4925_vm1 = vcmp.eq.s32.totalorder %v3508_v28, %v3893_v52 }
 0x424   :  { %v3908_v42 = vadd.s32 %v723_v56, %v721_v36  ;;  %v824_v37 = vsel %vm225_vm0, %v3904_v34, -inf  ;;  %v3916_v59 = vsel %vm4925_vm1, -inf, %v3492_v50 }
 0x425   :  { %825 = vmax.xlane.f32.xlu1 %v824_v37  ;;  %v735_v15 = vpop.xlane.xlu1 %734  ;;  %v809_v12 = vsel %vm225_vm0, %v3916_v59, -inf }
 0x426   :  { %4984 = vst [vmem:[#allocation27_spill] sm:$0xff] %v3908_v42  ;;  %v736_v44 = vcvt.f32.s32 %v735_v15  ;;  %810 = vmax.xlane.f32.xlu0 %v809_v12  ;;  %vm4926_vm2 = vcmp.eq.s32.totalorder %v3508_v28, %v3908_v42 }
 0x427   :  { %v3926_v63 = vsel %vm4926_vm2, -inf, %v3499_v22 }
 0x428   :  { %v3928_v11 = vadd.s32 %v738_v14, %v736_v44  ;;  %v830_v31 = vsel %vm225_vm0, %v3926_v63, -inf }
 0x429   :  { %831 = vmax.xlane.f32.xlu1 %v830_v31 }
 0x42a   :  { %4985 = vst [vmem:[#allocation28_spill] sm:$0xff] %v3928_v11  ;;  %vm4934_vm1 = vcmp.eq.s32.totalorder %v3508_v28, %v3928_v11 }
 0x42b   :  { %v3938_v5 = vsel %vm4934_vm1, -inf, %v3504_v62 }
 0x42c   :  { %v833_v56 = vsel %vm225_vm0, %v3938_v5, -inf }
 0x42d   :  { %834 = vmax.xlane.f32.xlu1 %v833_v56 }
 0x48e   :  { %v793_v1 = vpop.xlane.xlu0 %792 }
 0x48f   :  { %vm837_vm2 = vcmp.eq.f32.partialorder %v3745_v58, %v793_v1 }
 0x490   :  { %v853_v36 = vsel %vm837_vm2, %v3508_v28, 4 }
 0x491   :  { %v3945_v37 = vsel %vm225_vm0, %v853_v36, 2147483647 }
 0x492   :  { %v790_v15 = vpop.xlane.xlu0 %789  ;;  %v885_v12 = vshra.s32 %v3945_v37, 16 }
 0x493   :  { %vm836_vm15 = vcmp.eq.f32.partialorder %v3758_v60, %v790_v15 }
 0x494   :  { %v852_v14 = vsel %vm836_vm15, %v3508_v28, 4  ;;  %v3950_v44 = vcvt.s32.f32 %v885_v12 }
 0x495   :  { %v3953_v31 = vsel %vm225_vm0, %v852_v14, 2147483647 }
 0x496   :  { %888 = vmin.xlane.f32.xlu0 %v3950_v44  ;;  %v799_v58 = vpop.xlane.xlu0 %798  ;;  %v870_v56 = vshra.s32 %v3953_v31, 16  ;;  %v869_v27 = vand.u32 65535, %v3953_v31 }
 0x497   :  { %vm839_vm2 = vcmp.eq.f32.partialorder %v3771_v19, %v799_v58 }
 0x498   :  { %v855_v1 = vsel %vm839_vm2, %v3508_v28, 4  ;;  %v3959_v36 = vcvt.s32.f32 %v870_v56 }
 0x499   :  { %v3962_v60 = vsel %vm225_vm0, %v855_v1, 2147483647 }
 0x49a   :  { %873 = vmin.xlane.f32.xlu0 %v3959_v36  ;;  %v796_v15 = vpop.xlane.xlu0 %795  ;;  %v915_v12 = vshra.s32 %v3962_v60, 16 }
 0x49b   :  { %vm838_vm15 = vcmp.eq.f32.partialorder %v3784_v40, %v796_v15 }
 0x49c   :  { %v854_v14 = vsel %vm838_vm15, %v3508_v28, 4  ;;  %v3968_v11 = vcvt.s32.f32 %v915_v12 }
 0x49d   :  { %v3971_v19 = vsel %vm225_vm0, %v854_v14, 2147483647 }
 0x49e   :  { %v817_v58 = vpop.xlane.xlu1 %816  ;;  %918 = vmin.xlane.f32.xlu0 %v3968_v11  ;;  %v900_v56 = vshra.s32 %v3971_v19, 16  ;;  %v899_v31 = vand.u32 65535, %v3971_v19 }
 0x49f   :  { %vm845_vm2 = vcmp.eq.f32.partialorder %v3798_v0, %v817_v58 }
 0x4a0   :  { %v861_v1 = vsel %vm845_vm2, %v3508_v28, 4  ;;  %v3977_v62 = vcvt.s32.f32 %v900_v56 }
 0x4a1   :  { %v3980_v40 = vsel %vm225_vm0, %v861_v1, 2147483647 }
 0x4a2   :  { %v814_v15 = vpop.xlane.xlu1 %813  ;;  %903 = vmin.xlane.f32.xlu0 %v3977_v62  ;;  %v1005_v12 = vshra.s32 %v3980_v40, 16 }
 0x4a3   :  { %vm844_vm15 = vcmp.eq.f32.partialorder %v3812_v45, %v814_v15 }
 0x4a4   :  { %v860_v14 = vsel %vm844_vm15, %v3508_v28, 4  ;;  %v3986_v42 = vcvt.s32.f32 %v1005_v12 }
 0x4a5   :  { %v3989_v0 = vsel %vm225_vm0, %v860_v14, 2147483647 }
 0x4a6   :  { %1008 = vmin.xlane.f32.xlu1 %v3986_v42  ;;  %v823_v58 = vpop.xlane.xlu1 %822  ;;  %v990_v56 = vshra.s32 %v3989_v0, 16  ;;  %v989_v19 = vand.u32 65535, %v3989_v0 }
 0x4a7   :  { %vm847_vm2 = vcmp.eq.f32.partialorder %v3828_v53, %v823_v58  ;;  %v805_v1 = vpop.xlane.xlu0 %804 }
 0x4a8   :  { %v863_v22 = vsel %vm847_vm2, %v3508_v28, 4  ;;  %vm841_vm1 = vcmp.eq.f32.partialorder %v3840_v7, %v805_v1  ;;  %v3996_v45 = vcvt.s32.f32 %v990_v56 }
 0x4a9   :  { %v3999_v15 = vsel %vm225_vm0, %v863_v22, 2147483647  ;;  %v857_v12 = vsel %vm841_vm1, %v3508_v28, 4 }
 0x4aa   :  { %v4003_v14 = vsel %vm225_vm0, %v857_v12, 2147483647  ;;  %993 = vmin.xlane.f32.xlu1 %v3996_v45  ;;  %v820_v52 = vpop.xlane.xlu1 %819  ;;  %v1035_v53 = vshra.s32 %v3999_v15, 16 }
 0x4ab   :  { %vm846_vm15 = vcmp.eq.f32.partialorder %v3854_v25, %v820_v52  ;;  %v802_v58 = vpop.xlane.xlu0 %801  ;;  %v945_v7 = vshra.s32 %v4003_v14, 16  ;;  %v944_v0 = vand.u32 65535, %v4003_v14 }
 0x4ac   :  { %v862_v56 = vsel %vm846_vm15, %v3508_v28, 4  ;;  %vm840_vm2 = vcmp.eq.f32.partialorder %v3866_v39, %v802_v58  ;;  %v4011_v22 = vcvt.s32.f32 %v1035_v53 }
 0x4ad   :  { %v4014_v1 = vsel %vm225_vm0, %v862_v56, 2147483647  ;;  %v856_v12 = vsel %vm840_vm2, %v3508_v28, 4  ;;  %v4017_v50 = vcvt.s32.f32 %v945_v7 }
 0x4ae   :  { %v4020_v20 = vsel %vm225_vm0, %v856_v12, 2147483647  ;;  %1038 = vmin.xlane.f32.xlu1 %v4011_v22  ;;  %v829_v25 = vpop.xlane.xlu1 %828  ;;  %v1020_v52 = vshra.s32 %v4014_v1, 16 }
 0x4af   :  { %vm849_vm1 = vcmp.eq.f32.partialorder %v3879_v10, %v829_v25  ;;  %948 = vmin.xlane.f32.xlu0 %v4017_v50  ;;  %v808_v39 = vpop.xlane.xlu0 %807  ;;  %v930_v53 = vshra.s32 %v4020_v20, 16 }
 0x4b0   :  { %v865_v58 = vsel %vm849_vm1, %v3508_v28, 4  ;;  %vm842_vm15 = vcmp.eq.f32.partialorder %v3891_v61, %v808_v39  ;;  %v4029_v7 = vcvt.s32.f32 %v1020_v52 }
 0x4b1   :  { %v4032_v56 = vsel %vm225_vm0, %v865_v58, 2147483647  ;;  %v858_v12 = vsel %vm842_vm15, %v3508_v28, 4  ;;  %v4035_v18 = vcvt.s32.f32 %v930_v53 }
 0x4b2   :  { %v4038_v10 = vsel %vm225_vm0, %v858_v12, 2147483647  ;;  %1023 = vmin.xlane.f32.xlu1 %v4029_v7  ;;  %v826_v25 = vpop.xlane.xlu1 %825  ;;  %v1065_v51 = vshra.s32 %v4032_v56, 16 }
 0x4b3   :  { %vm848_vm2 = vcmp.eq.f32.partialorder %v3904_v34, %v826_v25  ;;  %933 = vmin.xlane.f32.xlu0 %v4035_v18  ;;  %v811_v61 = vpop.xlane.xlu0 %810  ;;  %v960_v52 = vshra.s32 %v4038_v10, 16 }
 0x4b4   :  { %v864_v39 = vsel %vm848_vm2, %v3508_v28, 4  ;;  %vm843_vm1 = vcmp.eq.f32.partialorder %v3916_v59, %v811_v61  ;;  %v4047_v53 = vcvt.s32.f32 %v1065_v51 }
 0x4b5   :  { %v4050_v58 = vsel %vm225_vm0, %v864_v39, 2147483647  ;;  %v859_v12 = vsel %vm843_vm1, %v3508_v28, 4  ;;  %v4053_v6 = vcvt.s32.f32 %v960_v52 }
 0x4b6   :  { %v4056_v34 = vsel %vm225_vm0, %v859_v12, 2147483647  ;;  %1068 = vmin.xlane.f32.xlu1 %v4047_v53  ;;  %v832_v25 = vpop.xlane.xlu1 %831  ;;  %v1050_v54 = vshra.s32 %v4050_v58, 16 }
 0x4b7   :  { %vm850_vm15 = vcmp.eq.f32.partialorder %v3926_v63, %v832_v25  ;;  %963 = vmin.xlane.f32.xlu0 %v4053_v6  ;;  %v975_v51 = vshra.s32 %v4056_v34, 16 }
 0x4b8   :  { %v866_v59 = vsel %vm850_vm15, %v3508_v28, 4  ;;  %v4064_v61 = vcvt.s32.f32 %v1050_v54 }
 0x4b9   :  { %v4067_v52 = vsel %vm225_vm0, %v866_v59, 2147483647  ;;  %v4069_v39 = vcvt.s32.f32 %v975_v51 }
 0x4ba   :  { %1053 = vmin.xlane.f32.xlu1 %v4064_v61  ;;  %v835_v12 = vpop.xlane.xlu1 %834  ;;  %v1080_v9 = vshra.s32 %v4067_v52, 16 }
 0x4bb   :  { %vm851_vm2 = vcmp.eq.f32.partialorder %v3938_v5, %v835_v12  ;;  %978 = vmin.xlane.f32.xlu0 %v4069_v39  ;;  %v2812_v5 = vld [vmem:[#allocation2 + $0x2c] ss:$20 sps:$4 sm:$0xff]   ;;  %v2814_v12 = vld [vmem:[#allocation2 + $0x28] ss:$20 sps:$4 sm:$0xff]  }
 0x4bc   :  { %v867_v63 = vsel %vm851_vm2, %v3508_v28, 4  ;;  %v4076_v25 = vcvt.s32.f32 %v1080_v9  ;;  %1486 = vmatprep.subr.bf16.mxu1 %v2812_v5  ;;  %v2815_v9 = vld [vmem:[#allocation2 + $0x54] ss:$20 sps:$4 sm:$0xff]   ;;  %v871_v5 = vcvt.s32.f32 %v869_v27 }
 0x4bd   :  { %v4079_v54 = vsel %vm225_vm0, %v867_v63, 2147483647  ;;  %1487 = vmatpush1.bf16.msra.mxu1 %v2814_v12  ;;  %v2818_v63 = vld [vmem:[#allocation2 + $0x7c] ss:$20 sps:$4 sm:$0xff]  }
 0x4be   :  { %1083 = vmin.xlane.f32.xlu1 %v4076_v25  ;;  %v1095_v51 = vshra.s32 %v4079_v54, 16  ;;  %1488 = vmatprep.subr.bf16.mxu1 %v2815_v9  ;;  %v2821_v9 = vld [vmem:[#allocation2 + $0xa4] ss:$20 sps:$4 sm:$0xff]  }
 0x4c0   :  { %v4083_v59 = vcvt.s32.f32 %v1095_v51  ;;  %v884_v51 = vand.u32 65535, %v3945_v37 }
 0x4c1   :  { %1489 = vmatpush1.bf16.msra.mxu1 %v2817_v2  ;;  %v914_v2 = vand.u32 65535, %v3962_v60  ;;  %v901_v60 = vcvt.s32.f32 %v899_v31 }
 0x4c2   :  { %1098 = vmin.xlane.f32.xlu1 %v4083_v59  ;;  %1490 = vmatprep.subr.bf16.mxu1 %v2818_v63  ;;  %v886_v49 = vcvt.s32.f32 %v884_v51 }
 0x4c3   :  { %v916_v12 = vcvt.s32.f32 %v914_v2  ;;  %v1034_v2 = vand.u32 65535, %v3999_v15  ;;  %v946_v15 = vcvt.s32.f32 %v944_v0  ;;  %v4963_v0 = vmov 0  }
 0x4c4   :  { %1516 = vmatprep.mubr.bf16.mxu1 %v4963_v0  ;;  %1629 = vmatprep.mubr.bf16.mxu0 %v4963_v0 }
 0x4c5   :  { %1491 = vmatpush1.bf16.msra.mxu1 %v2820_v30  ;;  %2747 = vset.pattern.permute.xlu1 %v4963_v0 }
 0x4c6   :  { %1492 = vmatprep.subr.bf16.mxu1 %v2821_v9 }
 0x523   :  { %v4087_v46 = vpop.xlane.xlu0 %888 }
 0x524   :  { %vm890_vm1 = vcmp.eq.f32.partialorder %v3950_v44, %v4087_v46  ;;  %v1004_v44 = vand.u32 65535, %v3980_v40  ;;  %v2824_v40 = vld [vmem:[#allocation2 + $0xcc] ss:$20 sps:$4 sm:$0xff]  }
 0x525   :  { %v891_v26 = vsel %vm890_vm1, %v886_v49, inf }
 0x526   :  { %892 = vmin.xlane.f32.xlu0 %v891_v26  ;;  %v1006_v51 = vcvt.s32.f32 %v1004_v44  ;;  %v2823_v26 = vld [vmem:[#allocation2 + $0xa0] ss:$20 sps:$4 sm:$0xff]   ;;  %v1019_v44 = vand.u32 65535, %v4014_v1 }
 0x527   :  { %v4092_v35 = vpop.xlane.xlu0 %873  ;;  %1493 = vmatpush1.bf16.msra.mxu1 %v2823_v26  ;;  %v1064_v26 = vand.u32 65535, %v4032_v56 }
 0x528   :  { %vm875_vm15 = vcmp.eq.f32.partialorder %v3959_v36, %v4092_v35  ;;  %1494 = vmatprep.subr.bf16.mxu1 %v2824_v40  ;;  %v1021_v1 = vcvt.s32.f32 %v1019_v44 }
 0x529   :  { %v876_v30 = vsel %vm875_vm15, %v871_v5, inf  ;;  %v1066_v56 = vcvt.s32.f32 %v1064_v26  ;;  %v2836_v26 = vld [vmem:[#allocation2 + $0x30] ss:$20 sps:$4 sm:$0xff]  }
 0x52a   :  { %877 = vmin.xlane.f32.xlu0 %v876_v30  ;;  %v2826_v30 = vld [vmem:[#allocation2 + $0xc8] ss:$20 sps:$4 sm:$0xff]  }
 0x52b   :  { %v4097_v37 = vpop.xlane.xlu0 %918  ;;  %1495 = vmatpush1.bf16.msra.mxu1 %v2826_v30  ;;  %v1049_v30 = vand.u32 65535, %v4050_v58 }
 0x52c   :  { %vm920_vm2 = vcmp.eq.f32.partialorder %v3968_v11, %v4097_v37 }
 0x52d   :  { %v921_v49 = vsel %vm920_vm2, %v916_v12, inf }
 0x52e   :  { %922 = vmin.xlane.f32.xlu0 %v921_v49  ;;  %v1036_v49 = vcvt.s32.f32 %v1034_v2 }
 0x52f   :  { %v4103_v27 = vpop.xlane.xlu0 %903 }
 0x530   :  { %vm905_vm1 = vcmp.eq.f32.partialorder %v3977_v62, %v4103_v27  ;;  %v991_v62 = vcvt.s32.f32 %v989_v19 }
 0x531   :  { %v906_v36 = vsel %vm905_vm1, %v901_v60, inf  ;;  %v2829_v60 = vld [vmem:[#allocation2 + $0xf0] ss:$20 sps:$4 sm:$0xff]  }
 0x532   :  { %907 = vmin.xlane.f32.xlu0 %v906_v36 }
 0x533   :  { %v4107_v63 = vpop.xlane.xlu1 %1008 }
 0x534   :  { %vm1010_vm15 = vcmp.eq.f32.partialorder %v3986_v42, %v4107_v63  ;;  %v2827_v42 = vld [vmem:[#allocation2 + $0xf4] ss:$20 sps:$4 sm:$0xff]  }
 0x535   :  { %v1011_v11 = vsel %vm1010_vm15, %v1006_v51, inf  ;;  %1496 = vmatprep.subr.bf16.mxu1 %v2827_v42  ;;  %v2830_v51 = vld [vmem:[#allocation2 + $0x11c] ss:$20 sps:$4 sm:$0xff]  }
 0x536   :  { %1012 = vmin.xlane.f32.xlu1 %v1011_v11  ;;  %1497 = vmatpush1.bf16.msra.mxu1 %v2829_v60  ;;  %v2832_v11 = vld [vmem:[#allocation2 + $0x118] ss:$20 sps:$4 sm:$0xff]  }
 0x537   :  { %v4112_v5 = vpop.xlane.xlu1 %993  ;;  %1498 = vmatprep.subr.bf16.mxu1 %v2830_v51  ;;  %v2838_v51 = vld [vmem:[#allocation2 + $0x34] ss:$20 sps:$4 sm:$0xff]  }
 0x538   :  { %vm995_vm2 = vcmp.eq.f32.partialorder %v3996_v45, %v4112_v5  ;;  %v929_v45 = vand.u32 65535, %v4020_v20 }
 0x539   :  { %v996_v12 = vsel %vm995_vm2, %v991_v62, inf }
 0x53a   :  { %997 = vmin.xlane.f32.xlu1 %v996_v12  ;;  %v931_v20 = vcvt.s32.f32 %v929_v45  ;;  %1499 = vmatpush1.bf16.msra.mxu1 %v2832_v11  ;;  %v2843_v11 = vld [vmem:[#allocation2 + $0x38] ss:$20 sps:$4 sm:$0xff]  }
 0x53b   :  { %v4118_v31 = vpop.xlane.xlu1 %1038 }
 0x53c   :  { %v4121_v36 = vpop.xlane.xlu0 %948  ;;  %vm1040_vm1 = vcmp.eq.f32.partialorder %v4011_v22, %v4118_v31 }
 0x53d   :  { %vm950_vm15 = vcmp.eq.f32.partialorder %v4017_v50, %v4121_v36  ;;  %v1041_v14 = vsel %vm1040_vm1, %v1036_v49, inf  ;;  %v959_v50 = vand.u32 65535, %v4038_v10  ;;  %1517 = vmatmul.mubr.bf16.vlgmr.msra.gmra.mrb[0].mxu1 %v3101_v13 }
 0x53e   :  { %1042 = vmin.xlane.f32.xlu1 %v1041_v14  ;;  %v951_v9 = vsel %vm950_vm15, %v946_v15, inf  ;;  %1526 = vmatprep.mubr.bf16.mxu1 %v4963_v0  ;;  %v1094_v14 = vand.u32 65535, %v4079_v54  ;;  %v2833_v54 = vld [vmem:[#allocation2 + $0x8] ss:$20 sps:$4 sm:$0xff]  }
 0x53f   :  { %v4128_v19 = vpop.xlane.xlu1 %1023  ;;  %952 = vmin.xlane.f32.xlu0 %v951_v9  ;;  %v961_v10 = vcvt.s32.f32 %v959_v50  ;;  %v2846_v50 = vld [vmem:[#allocation2 + $0x84] ss:$20 sps:$4 sm:$0xff]  }
 0x540   :  { %v4131_v22 = vpop.xlane.xlu0 %933  ;;  %vm1025_vm2 = vcmp.eq.f32.partialorder %v4029_v7, %v4128_v19 }
 0x541   :  { %vm935_vm1 = vcmp.eq.f32.partialorder %v4035_v18, %v4131_v22  ;;  %v1026_v40 = vsel %vm1025_vm2, %v1021_v1, inf  ;;  %v974_v18 = vand.u32 65535, %v4056_v34  ;;  %v1079_v34 = vand.u32 65535, %v4067_v52  ;;  %v2839_v1 = vld [vmem:[#allocation2 + $0x10] ss:$20 sps:$4 sm:$0xff]  }
 0x542   :  { %1027 = vmin.xlane.f32.xlu1 %v1026_v40  ;;  %v936_v62 = vsel %vm935_vm1, %v931_v20, inf  ;;  %2645 = vmatprep.subr.bf16.mxu1 %v2839_v1  ;;  %v2840_v20 = vld [vmem:[#allocation2 + $0x58] ss:$20 sps:$4 sm:$0xff]   ;;  %v2847_v40 = vld [vmem:[#allocation2 + $0x60] ss:$20 sps:$4 sm:$0xff]  }
 0x543   :  { %v4138_v2 = vpop.xlane.xlu1 %1068  ;;  %937 = vmin.xlane.f32.xlu0 %v936_v62  ;;  %v976_v44 = vcvt.s32.f32 %v974_v18  ;;  %v1081_v45 = vcvt.s32.f32 %v1079_v34  ;;  %2646 = vmatpush3.bf16.msra.mxu1 %v2839_v1  ;;  %v2844_v62 = vld [vmem:[#allocation2 + $0x80] ss:$20 sps:$4 sm:$0xff]   ;;  %v2859_v34 = vld [vmem:[#allocation2 + $0xd8] ss:$20 sps:$4 sm:$0xff]  }
 0x544   :  { %v4142_v7 = vpop.xlane.xlu0 %963  ;;  %vm1070_vm15 = vcmp.eq.f32.partialorder %v4047_v53, %v4138_v2  ;;  %v1051_v53 = vcvt.s32.f32 %v1049_v30  ;;  %2647 = vmatprep.subr.bf16.mxu1 %v2843_v11  ;;  %v2851_v30 = vld [vmem:[#allocation2 + $0x88] ss:$20 sps:$4 sm:$0xff]  }
 0x545   :  { %vm965_vm2 = vcmp.eq.f32.partialorder %v4053_v6, %v4142_v7  ;;  %v1071_v12 = vsel %vm1070_vm15, %v1066_v56, inf  ;;  %1527 = vmatmul.mubr.bf16.gmra.mrb[4].mxu1 %v3112_v17  ;;  %v2850_v56 = vld [vmem:[#allocation2 + $0xac] ss:$20 sps:$4 sm:$0xff]   ;;  %v2854_v18 = vld [vmem:[#allocation2 + $0xd4] ss:$20 sps:$4 sm:$0xff]  }
 0x546   :  { %1072 = vmin.xlane.f32.xlu1 %v1071_v12  ;;  %v966_v58 = vsel %vm965_vm2, %v961_v10, inf  ;;  %1536 = vmatprep.mubr.bf16.mxu1 %v4963_v0  ;;  %v2848_v10 = vld [vmem:[#allocation2 + $0xa8] ss:$20 sps:$4 sm:$0xff]   ;;  %v2855_v12 = vld [vmem:[#allocation2 + $0xb0] ss:$20 sps:$4 sm:$0xff]  }
 0x547   :  { %v4153_v42 = vpop.xlane.xlu1 %1053  ;;  %967 = vmin.xlane.f32.xlu0 %v966_v58  ;;  %2648 = vmatpush3.bf16.msra.mxu1 %v2843_v11  ;;  %v2852_v58 = vld [vmem:[#allocation2 + $0xd0] ss:$20 sps:$4 sm:$0xff]   ;;  %v910_v11 = vcvt.f32.s32 %v4103_v27  ;;  %v1015_v27 = vcvt.f32.s32 %v4107_v63  ;;  %v1000_v63 = vcvt.f32.s32 %v4112_v5  ;;  %v1045_v5 = vcvt.f32.s32 %v4118_v31 }
 0x548   :  { %v4156_v49 = vpop.xlane.xlu0 %978  ;;  %vm1055_vm1 = vcmp.eq.f32.partialorder %v4064_v61, %v4153_v42  ;;  %2649 = vmatprep.subr.bf16.mxu1 %v2847_v40 }
 0x549   :  { %vm980_vm15 = vcmp.eq.f32.partialorder %v4069_v39, %v4156_v49  ;;  %v1056_v6 = vsel %vm1055_vm1, %v1051_v53, inf  ;;  %v1096_v39 = vcvt.s32.f32 %v1094_v14  ;;  %v2858_v53 = vld [vmem:[#allocation2 + $0xfc] ss:$20 sps:$4 sm:$0xff]   ;;  %v2860_v14 = vld [vmem:[#allocation2 + $0x120] ss:$20 sps:$4 sm:$0xff]   ;;  %v1046_v31 = vshll.u32 %v1045_v5, 16 }
 0x54a   :  { %1057 = vmin.xlane.f32.xlu1 %v1056_v6  ;;  %v981_v60 = vsel %vm980_vm15, %v976_v44, inf  ;;  %v4986_v44 = vld [vmem:[#allocation8_spill] sm:$0xff]  ;;  %v2856_v6 = vld [vmem:[#allocation2 + $0xf8] ss:$20 sps:$4 sm:$0xff]  }
 0x54b   :  { %v4162_v15 = vpop.xlane.xlu1 %1083  ;;  %982 = vmin.xlane.f32.xlu0 %v981_v60  ;;  %2650 = vmatpush3.bf16.msra.mxu1 %v2847_v40  ;;  %v2862_v60 = vld [vmem:[#allocation2 + $0x124] ss:$20 sps:$4 sm:$0xff]  }
 0x54c   :  { %vm1085_vm2 = vcmp.eq.f32.partialorder %v4076_v25, %v4162_v15  ;;  %v2835_v25 = vld [vmem:[#allocation2 + $0xc] ss:$20 sps:$4 sm:$0xff]   ;;  %2651 = vmatprep.subr.bf16.mxu1 %v2851_v30 }
 0x54d   :  { %v1086_v52 = vsel %vm1085_vm2, %v1081_v45, inf  ;;  %1537 = vmatmul.mubr.bf16.gmra.mrb[8].mxu1 %v3129_v23  ;;  %1597 = vmatprep.subr.bf16.mxu0 %v2835_v25  ;;  %v2863_v45 = vld [vmem:[#allocation2 + $0x100] ss:$20 sps:$4 sm:$0xff]  }
 0x54e   :  { %1087 = vmin.xlane.f32.xlu1 %v1086_v52  ;;  %1546 = vmatprep.mubr.bf16.mxu1 %v4963_v0  ;;  %v2864_v52 = vld [vmem:[#allocation2 + $0x128] ss:$20 sps:$4 sm:$0xff]  }
 0x54f   :  { %v4169_v61 = vpop.xlane.xlu1 %1098  ;;  %1598 = vmatpush1.bf16.msra.mxu0 %v2833_v54  ;;  %2652 = vmatpush3.bf16.msra.mxu1 %v2851_v30 }
 0x550   :  { %vm1100_vm1 = vcmp.eq.f32.partialorder %v4083_v59, %v4169_v61  ;;  %1599 = vmatprep.subr.bf16.mxu0 %v2838_v51  ;;  %v2842_v59 = vld [vmem:[#allocation2 + $0x5c] ss:$20 sps:$4 sm:$0xff]   ;;  %2653 = vmatprep.subr.bf16.mxu1 %v2855_v12  ;;  %v925_v51 = vcvt.f32.s32 %v4097_v37 }
 0x551   :  { %v1101_v9 = vsel %vm1100_vm1, %v1096_v39, inf  ;;  %v4987_v39 = vld [vmem:[#allocation9_spill] sm:$0xff] }
 0x552   :  { %1102 = vmin.xlane.f32.xlu1 %v1101_v9  ;;  %v926_v37 = vshll.u32 %v925_v51, 16 }
 0x553   :  { %1600 = vmatpush1.bf16.msra.mxu0 %v2836_v26  ;;  %2654 = vmatpush3.bf16.msra.mxu1 %v2855_v12 }
 0x554   :  { %1601 = vmatprep.subr.bf16.mxu0 %v2842_v59  ;;  %2655 = vmatprep.subr.bf16.mxu1 %v2859_v34 }
 0x555   :  { %1547 = vmatmul.mubr.bf16.gmra.mrb[12].mxu1 %v3131_v24 }
 0x556   :  { %1556 = vmatprep.mubr.bf16.mxu1 %v4963_v0 }
 0x557   :  { %1602 = vmatpush1.bf16.msra.mxu0 %v2840_v20  ;;  %2656 = vmatpush3.bf16.msra.mxu1 %v2859_v34 }
 0x558   :  { %1603 = vmatprep.subr.bf16.mxu0 %v2846_v50  ;;  %2657 = vmatprep.subr.bf16.mxu1 %v2863_v45 }
 0x55b   :  { %1604 = vmatpush1.bf16.msra.mxu0 %v2844_v62  ;;  %2658 = vmatpush3.bf16.msra.mxu1 %v2863_v45 }
 0x55c   :  { %1605 = vmatprep.subr.bf16.mxu0 %v2850_v56  ;;  %2659 = vmatprep.subr.bf16.mxu1 %v2864_v52  ;;  %v911_v56 = vshll.u32 %v910_v11, 16  ;;  %v970_v11 = vcvt.f32.s32 %v4142_v7 }
 0x55d   :  { %1557 = vmatmul.mubr.bf16.gmra.mrb[16].mxu1 %v3142_v29 }
 0x55e   :  { %1566 = vmatprep.mubr.bf16.mxu1 %v4963_v0 }
 0x55f   :  { %1606 = vmatpush1.bf16.msra.mxu0 %v2848_v10  ;;  %2660 = vmatpush3.bf16.msra.mxu1 %v2864_v52 }
 0x560   :  { %1607 = vmatprep.subr.bf16.mxu0 %v2854_v18 }
 0x563   :  { %1608 = vmatpush1.bf16.msra.mxu0 %v2852_v58  ;;  %v1016_v58 = vshll.u32 %v1015_v27, 16 }
 0x564   :  { %1609 = vmatprep.subr.bf16.mxu0 %v2858_v53 }
 0x565   :  { %1567 = vmatmul.mubr.bf16.gmra.mrb[20].mxu1 %v3153_v33 }
 0x566   :  { %1576 = vmatprep.mubr.bf16.mxu1 %v4963_v0 }
 0x567   :  { %1610 = vmatpush1.bf16.msra.mxu0 %v2856_v6 }
 0x568   :  { %1611 = vmatprep.subr.bf16.mxu0 %v2862_v60  ;;  %v1001_v60 = vshll.u32 %v1000_v63, 16  ;;  %v971_v63 = vshll.u32 %v970_v11, 16  ;;  %v5002_v11 = vld [vmem:[#allocation16_spill] sm:$0xff] }
 0x56b   :  { %1612 = vmatpush1.bf16.msra.mxu0 %v2860_v14 }
 0x56d   :  { %1577 = vmatmul.mubr.bf16.gmra.mrb[24].mxu1 %v4986_v44 }
 0x56e   :  { %1586 = vmatprep.mubr.bf16.mxu1 %v4963_v0  ;;  %1630 = vmatmul.mubr.bf16.vlgmr.msra.gmra.mrb[16].mxu0 %v3101_v13 }
 0x56f   :  { %1639 = vmatprep.mubr.bf16.mxu0 %v4963_v0 }
 0x575   :  { %1587 = vmatmul.mubr.bf16.gmra.mrb[28].mxu1 %v4987_v39 }
 0x576   :  { %2661 = vmatprep.mubr.bf16.mxu1 %v3101_v13  ;;  %1640 = vmatmul.mubr.bf16.gmra.mrb[20].mxu0 %v3112_v17  ;;  %v895_v13 = vcvt.f32.s32 %v4087_v46 }
 0x577   :  { %1649 = vmatprep.mubr.bf16.mxu0 %v4963_v0 }
 0x57d   :  { %2662 = vmatmul.mubr.bf16.vlgmr.msra.gmra.mrb[32].mxu1 %v3112_v17 }
 0x57e   :  { %2665 = vmatprep.mubr.bf16.mxu1 %v3129_v23  ;;  %1650 = vmatmul.mubr.bf16.gmra.mrb[24].mxu0 %v3129_v23  ;;  %v896_v23 = vshll.u32 %v895_v13, 16 }
 0x57f   :  { %1659 = vmatprep.mubr.bf16.mxu0 %v4963_v0 }
 0x585   :  { %2666 = vmatmul.mubr.bf16.gmra.mrb[36].mxu1 %v3131_v24 }
 0x586   :  { %2669 = vmatprep.mubr.bf16.mxu1 %v3142_v29  ;;  %1660 = vmatmul.mubr.bf16.gmra.mrb[28].mxu0 %v3131_v24  ;;  %v880_v24 = vcvt.f32.s32 %v4092_v35 }
 0x587   :  { %1669 = vmatprep.mubr.bf16.mxu0 %v4963_v0 }
 0x588   :  { %v881_v54 = vshll.u32 %v880_v24, 16 }
 0x58d   :  { %2670 = vmatmul.mubr.bf16.gmra.mrb[40].mxu1 %v3153_v33 }
 0x58e   :  { %2673 = vmatprep.mubr.bf16.mxu1 %v4986_v44  ;;  %1670 = vmatmul.mubr.bf16.gmra.mrb[32].mxu0 %v3142_v29  ;;  %v757_v29 = vsel %vm741_vm3, %v3429_v16, 0.0 }
 0x58f   :  { %1679 = vmatprep.mubr.bf16.mxu0 %v4963_v0 }
 0x595   :  { %2674 = vmatmul.mubr.bf16.gmra.mrb[44].mxu1 %v4987_v39 }
 0x596   :  { %1680 = vmatmul.mubr.bf16.gmra.mrb[36].mxu0 %v3153_v33 }
 0x597   :  { %1689 = vmatprep.mubr.bf16.mxu0 %v4963_v0 }
 0x59e   :  { %1690 = vmatmul.mubr.bf16.gmra.mrb[40].mxu0 %v4986_v44 }
 0x59f   :  { %1699 = vmatprep.mubr.bf16.mxu0 %v4963_v0 }
 0x5a6   :  { %1700 = vmatmul.mubr.bf16.gmra.mrb[44].mxu0 %v4987_v39 }
 0x5b3   :  { %v893_v17 = vpop.xlane.xlu0 %892 }
 0x5b4   :  { %v894_v9 = vcvt.f32.s32 %v893_v17  ;;  %v1030_v17 = vcvt.f32.s32 %v4128_v19 }
 0x5b6   :  { %v897_v25 = vadd.s32 %v896_v23, %v894_v9 }
 0x5b7   :  { %v878_v33 = vpop.xlane.xlu0 %877 }
 0x5b8   :  { %vm1109_vm15 = vcmp.eq.s32.totalorder %v3508_v28, %v897_v25  ;;  %v879_v46 = vcvt.f32.s32 %v878_v33 }
 0x5b9   :  { %v4216_v1 = vsel %vm1109_vm15, %v3429_v16, %v757_v29  ;;  %v767_v29 = vsel %vm751_vm9, %v3459_v47, 0.0 }
 0x5ba   :  { %v882_v35 = vadd.s32 %v881_v54, %v879_v46  ;;  %v1143_v26 = vsel %vm225_vm0, %v4216_v1, 0.0  ;;  %v4989_v54 = vld [vmem:[#allocation10_spill] sm:$0xff] }
 0x5bb   :  { %1144 = vadd.xlane.f32.xlu0 %v1143_v26  ;;  %v923_v59 = vpop.xlane.xlu0 %922  ;;  %v761_v46 = vsel %vm745_vm10, %v4989_v54, 0.0  ;;  %v1075_v26 = vcvt.f32.s32 %v4138_v2 }
 0x5bc   :  { %vm1108_vm3 = vcmp.eq.s32.totalorder %v3508_v28, %v882_v35  ;;  %v924_v20 = vcvt.f32.s32 %v923_v59  ;;  %v4991_v35 = vld [vmem:[#allocation11_spill] sm:$0xff] }
 0x5bd   :  { %v4227_v16 = vsel %vm1108_vm3, %v3434_v21, %v756_v38 }
 0x5be   :  { %v927_v50 = vadd.s32 %v926_v37, %v924_v20  ;;  %v1140_v40 = vsel %vm225_vm0, %v4227_v16, 0.0  ;;  %v1031_v37 = vshll.u32 %v1030_v17, 16 }
 0x5bf   :  { %1141 = vadd.xlane.f32.xlu0 %v1140_v40  ;;  %v908_v62 = vpop.xlane.xlu0 %907 }
 0x5c0   :  { %vm1111_vm4 = vcmp.eq.s32.totalorder %v3508_v28, %v927_v50  ;;  %v909_v30 = vcvt.f32.s32 %v908_v62 }
 0x5c1   :  { %v4238_v21 = vsel %vm1111_vm4, %v3439_v55, %v759_v4 }
 0x5c2   :  { %v912_v10 = vadd.s32 %v911_v56, %v909_v30  ;;  %v1149_v18 = vsel %vm225_vm0, %v4238_v21, 0.0  ;;  %v4993_v56 = vld [vmem:[#allocation12_spill] sm:$0xff] }
 0x5c3   :  { %v1013_v12 = vpop.xlane.xlu1 %1012  ;;  %1150 = vadd.xlane.f32.xlu0 %v1149_v18  ;;  %v760_v27 = vsel %vm744_vm12, %v4993_v56, 0.0  ;;  %v1076_v18 = vshll.u32 %v1075_v26, 16 }
 0x5c4   :  { %vm1110_vm5 = vcmp.eq.s32.totalorder %v3508_v28, %v912_v10  ;;  %v1014_v53 = vcvt.f32.s32 %v1013_v12 }
 0x5c5   :  { %v4249_v55 = vsel %vm1110_vm5, %v3444_v57, %v758_v48  ;;  %v955_v57 = vcvt.f32.s32 %v4121_v36  ;;  %v940_v36 = vcvt.f32.s32 %v4131_v22  ;;  %v1060_v48 = vcvt.f32.s32 %v4153_v42 }
 0x5c6   :  { %v1017_v34 = vadd.s32 %v1016_v58, %v1014_v53  ;;  %v1146_v44 = vsel %vm225_vm0, %v4249_v55, 0.0  ;;  %v4961_v42 = vmov 1  }
 0x5c7   :  { %v998_v6 = vpop.xlane.xlu1 %997  ;;  %1147 = vadd.xlane.f32.xlu0 %v1146_v44  ;;  %v941_v40 = vshll.u32 %v940_v36, 16  ;;  %v985_v44 = vcvt.f32.s32 %v4156_v49 }
 0x5c8   :  { %v999_v45 = vcvt.f32.s32 %v998_v6  ;;  %vm1117_vm6 = vcmp.eq.s32.totalorder %v3508_v28, %v1017_v34  ;;  %2748 = vset.pattern.permute.xlu0 %v4961_v42 }
 0x5c9   :  { %v4261_v14 = vsel %vm1117_vm6, %v3449_v3, %v765_v43  ;;  %v956_v3 = vshll.u32 %v955_v57, 16 }
 0x5ca   :  { %v1002_v52 = vadd.s32 %v1001_v60, %v999_v45  ;;  %v1167_v39 = vsel %vm225_vm0, %v4261_v14, 0.0  ;;  %v4995_v60 = vld [vmem:[#allocation13_spill] sm:$0xff] }
 0x5cb   :  { %1168 = vadd.xlane.f32.xlu1 %v1167_v39  ;;  %v1043_v13 = vpop.xlane.xlu1 %1042  ;;  %v769_v45 = vsel %vm753_vm13, %v4995_v60, 0.0  ;;  %v4997_v39 = vld [vmem:[#allocation14_spill] sm:$0xff]  ;;  %vm2263_vm13 = vcmask 1043456  }
 0x5cc   :  { %v1044_v23 = vcvt.f32.s32 %v1043_v13  ;;  %v953_v24 = vpop.xlane.xlu0 %952  ;;  %vm1116_vm7 = vcmp.eq.s32.totalorder %v3508_v28, %v1002_v52  ;;  %v762_v13 = vsel %vm746_vm14, %v4997_v39, 0.0  ;;  %2677 = vmatprep.subr.msk.mxu0 %vm2263_vm13, %v2230_v8  ;;  %2735 = vmatprep.subr.msk.mxu1 %vm2263_vm13, %v2230_v8 }
 0x5cd   :  { %v954_v9 = vcvt.f32.s32 %v953_v24  ;;  %v4273_v25 = vsel %vm1116_vm7, %v3454_v41, %v764_v32  ;;  %v766_v41 = vsel %vm750_vm11, %v4991_v35, 0.0  ;;  %2678 = vmatpush3.msk.msra.mxu0 %vm2263_vm13, %v2230_v8  ;;  %2736 = vmatpush3.msk.msra.mxu1 %vm2263_vm13, %v2230_v8 }
 0x5ce   :  { %v1047_v33 = vadd.s32 %v1046_v31, %v1044_v23  ;;  %v1164_v19 = vsel %vm225_vm0, %v4273_v25, 0.0  ;;  %v1061_v31 = vshll.u32 %v1060_v48, 16 }
 0x5cf   :  { %v957_v38 = vadd.s32 %v956_v3, %v954_v9  ;;  %1165 = vadd.xlane.f32.xlu1 %v1164_v19  ;;  %v1028_v59 = vpop.xlane.xlu1 %1027  ;;  %v1090_v3 = vcvt.f32.s32 %v4162_v15 }
 0x5d0   :  { %v1029_v20 = vcvt.f32.s32 %v1028_v59  ;;  %v938_v50 = vpop.xlane.xlu0 %937  ;;  %vm1119_vm8 = vcmp.eq.s32.totalorder %v3508_v28, %v1047_v33  ;;  %v1105_v59 = vcvt.f32.s32 %v4169_v61 }
 0x5d1   :  { %vm1113_vm9 = vcmp.eq.s32.totalorder %v3508_v28, %v957_v38  ;;  %v939_v4 = vcvt.f32.s32 %v938_v50  ;;  %v4294_v62 = vsel %vm1119_vm8, %v3459_v47, %v767_v29  ;;  %v986_v29 = vshll.u32 %v985_v44, 16  ;;  %v5009_v44 = vld [vmem:[#allocation28_spill] sm:$0xff] }
 0x5d2   :  { %v1032_v30 = vadd.s32 %v1031_v37, %v1029_v20  ;;  %v1173_v7 = vsel %vm225_vm0, %v4294_v62, 0.0  ;;  %v4303_v10 = vsel %vm1113_vm9, %v4989_v54, %v761_v46  ;;  %v4999_v46 = vld [vmem:[#allocation15_spill] sm:$0xff]  ;;  %v1091_v38 = vshll.u32 %v1090_v3, 16  ;;  %v5003_v20 = vld [vmem:[#allocation26_spill] sm:$0xff] }
 0x5d3   :  { %v942_v12 = vadd.s32 %v941_v40, %v939_v4  ;;  %1174 = vadd.xlane.f32.xlu1 %v1173_v7  ;;  %v1073_v58 = vpop.xlane.xlu1 %1072  ;;  %v1155_v47 = vsel %vm225_vm0, %v4303_v10, 0.0  ;;  %vm5004_vm15 = vcmp.eq.s32.totalorder %v3508_v28, %v5003_v20  ;;  %v5006_v7 = vld [vmem:[#allocation27_spill] sm:$0xff]  ;;  %v1106_v48 = vshll.u32 %v1105_v59, 16 }
 0x5d4   :  { %v1074_v53 = vcvt.f32.s32 %v1073_v58  ;;  %1156 = vadd.xlane.f32.xlu0 %v1155_v47  ;;  %v968_v34 = vpop.xlane.xlu0 %967  ;;  %vm1118_vm10 = vcmp.eq.s32.totalorder %v3508_v28, %v1032_v30  ;;  %v763_v50 = vsel %vm5004_vm15, %v5002_v11, 0.0  ;;  %v5005_v30 = vld [vmem:[#allocation17_spill] sm:$0xff]  ;;  %vm5007_vm4 = vcmp.eq.s32.totalorder %v3508_v28, %v5006_v7 }
 0x5d5   :  { %vm1112_vm11 = vcmp.eq.s32.totalorder %v3508_v28, %v942_v12  ;;  %v969_v43 = vcvt.f32.s32 %v968_v34  ;;  %v4312_v6 = vsel %vm1118_vm10, %v4991_v35, %v766_v41  ;;  %v5000_v35 = vld [vmem:[#allocation25_spill] sm:$0xff]  ;;  %v5008_v34 = vld [vmem:[#allocation18_spill] sm:$0xff]  ;;  %vm5010_vm6 = vcmp.eq.s32.totalorder %v3508_v28, %v5009_v44 }
 0x5d6   :  { %v1077_v57 = vadd.s32 %v1076_v18, %v1074_v53  ;;  %v1170_v52 = vsel %vm225_vm0, %v4312_v6, 0.0  ;;  %v4322_v49 = vsel %vm1112_vm11, %v4993_v56, %v760_v27  ;;  %vm5001_vm2 = vcmp.eq.s32.totalorder %v3508_v28, %v5000_v35 }
 0x5d7   :  { %v972_v17 = vadd.s32 %v971_v63, %v969_v43  ;;  %1171 = vadd.xlane.f32.xlu1 %v1170_v52  ;;  %v1058_v23 = vpop.xlane.xlu1 %1057  ;;  %v1152_v24 = vsel %vm225_vm0, %v4322_v49, 0.0  ;;  %v768_v22 = vsel %vm5001_vm2, %v4999_v46, 0.0  ;;  %v770_v18 = vsel %vm5007_vm4, %v5005_v30, 0.0 }
 0x5d8   :  { %vm1121_vm12 = vcmp.eq.s32.totalorder %v3508_v28, %v1077_v57  ;;  %v1059_v36 = vcvt.f32.s32 %v1058_v23  ;;  %1153 = vadd.xlane.f32.xlu0 %v1152_v24  ;;  %v983_v9 = vpop.xlane.xlu0 %982  ;;  %v771_v43 = vsel %vm5010_vm6, %v5008_v34, 0.0 }
 0x5d9   :  { %vm1114_vm14 = vcmp.eq.s32.totalorder %v3508_v28, %v972_v17  ;;  %v984_v33 = vcvt.f32.s32 %v983_v9  ;;  %v4337_v19 = vsel %vm1121_vm12, %v4995_v60, %v769_v45 }
 0x5da   :  { %v1062_v15 = vadd.s32 %v1061_v31, %v1059_v36  ;;  %v1179_v54 = vsel %vm225_vm0, %v4337_v19, 0.0  ;;  %v4342_v51 = vsel %vm1114_vm14, %v4997_v39, %v762_v13 }
 0x5db   :  { %v987_v41 = vadd.s32 %v986_v29, %v984_v33  ;;  %1180 = vadd.xlane.f32.xlu1 %v1179_v54  ;;  %v1088_v26 = vpop.xlane.xlu1 %1087  ;;  %v1158_v53 = vsel %vm225_vm0, %v4342_v51, 0.0 }
 0x5dc   :  { %vm1120_vm1 = vcmp.eq.s32.totalorder %v3508_v28, %v1062_v15  ;;  %v1089_v37 = vcvt.f32.s32 %v1088_v26 }
 0x5dd   :  { %vm1115_vm3 = vcmp.eq.s32.totalorder %v3508_v28, %v987_v41  ;;  %v4356_v40 = vsel %vm1120_vm1, %v4999_v46, %v768_v22 }
 0x5de   :  { %v1092_v4 = vadd.s32 %v1091_v38, %v1089_v37  ;;  %v1176_v56 = vsel %vm225_vm0, %v4356_v40, 0.0  ;;  %v4361_v2 = vsel %vm1115_vm3, %v5002_v11, %v763_v50  ;;  %v4438_v11 = vld [vmem:[%s4919_s4] ss:$0 sm:$0xff]  ;;  %s3016_s4 = smov [#allocation5]  }
 0x5df   :  { %1177 = vadd.xlane.f32.xlu1 %v1176_v56  ;;  %v1103_v61 = vpop.xlane.xlu1 %1102  ;;  %v1161_v27 = vsel %vm225_vm0, %v4361_v2, 0.0  ;;  %s2449_s13 = sshll.u32 %s3016_s4, 4  ;;  %s2450_s13 = int_to_ptr.vmem [resolvable:$true] %s2449_s13 }
 0x5e0   :  { %vm1122_vm5 = vcmp.eq.s32.totalorder %v3508_v28, %v1092_v4  ;;  %v1104_v12 = vcvt.f32.s32 %v1103_v61  ;;  %1162 = vadd.xlane.f32.xlu0 %v1161_v27  ;;  %s2983_s14 = scalar_lea.vmem %s2450_s13, 2048  ;;  %p2988_p9 = scmp.lt.s32.totalorder %s2450_s13, %s2450_s13 }
 0x5e1   :  { %v4371_v58 = vsel %vm1122_vm5, %v5005_v30, %v770_v18  ;;  %p2984_p8 = scmp.ne.s32.totalorder %s2450_s13, %s2983_s14  ;;  %p2989_p10 = scmp.lt.s32.totalorder %s2983_s14, %s2983_s14 }
 0x5e2   :  { %v1107_v47 = vadd.s32 %v1106_v48, %v1104_v12  ;;  %v1182_v63 = vsel %vm225_vm0, %v4371_v58, 0.0 }
 0x5e3   :  { %1183 = vadd.xlane.f32.xlu1 %v1182_v63  ;;  %p2990_p11 = por %p2989_p10, %p2988_p9 }
 0x5e4   :  { %vm1123_vm7 = vcmp.eq.s32.totalorder %v3508_v28, %v1107_v47  ;;  %1159 = vadd.xlane.f32.xlu0 %v1158_v53 }
 0x5e5   :  { %v4383_v60 = vsel %vm1123_vm7, %v5008_v34, %v771_v43  ;;  %p2991_p12 = pnand %p2990_p11, %p2984_p8 }
 0x5e6   :  { %v1185_v5 = vsel %vm225_vm0, %v4383_v60, 0.0 }
 0x5e7   :  { %1186 = vadd.xlane.f32.xlu1 %v1185_v5 }
 0x610   :  { %v4387_v45 = vpop.f32.mrb[0].mxu1 }
 0x611   :  { %v4389_v57 = vpop.f32.mrb[1].mxu1 }
 0x612   :  { %v4391_v52 = vpop.f32.mrb[2].mxu1 }
 0x613   :  { %v4393_v39 = vpop.f32.mrb[3].mxu1 }
 0x618   :  { %v4395_v32 = vpop.f32.mrb[4].mxu1 }
 0x619   :  { %v4397_v13 = vpop.f32.mrb[5].mxu1 }
 0x61a   :  { %v4399_v28 = vpop.f32.mrb[6].mxu1 }
 0x61b   :  { %v4401_v31 = vpop.f32.mrb[7].mxu1 }
 0x620   :  { %v4403_v17 = vpop.f32.mrb[8].mxu1 }
 0x621   :  { %v4405_v23 = vpop.f32.mrb[9].mxu1 }
 0x622   :  { %v4407_v24 = vpop.f32.mrb[10].mxu1 }
 0x623   :  { %v4409_v3 = vpop.f32.mrb[11].mxu1 }
 0x628   :  { %v4411_v36 = vpop.f32.mrb[12].mxu1 }
 0x629   :  { %v4413_v9 = vpop.f32.mrb[13].mxu1 }
 0x62a   :  { %v4415_v8 = vpop.f32.mrb[14].mxu1 }
 0x62b   :  { %v4417_v29 = vpop.f32.mrb[15].mxu1 }
 0x630   :  { %v4419_v15 = vpop.f32.mrb[16].mxu1 }
 0x631   :  { %5011 = vst [vmem:[#allocation8_spill] sm:$0xff] %v4419_v15  ;;  %v4421_v54 = vpop.f32.mrb[17].mxu1 }
 0x632   :  { %5012 = vst [vmem:[#allocation9_spill] sm:$0xff] %v4421_v54  ;;  %v4423_v46 = vpop.f32.mrb[18].mxu1 }
 0x633   :  { %v4425_v35 = vpop.f32.mrb[19].mxu1 }
 0x638   :  { %v4427_v41 = vpop.f32.mrb[20].mxu1 }
 0x639   :  { %5013 = vst [vmem:[#allocation19_spill] sm:$0xff] %v4427_v41  ;;  %v4429_v26 = vpop.f32.mrb[21].mxu1 }
 0x63a   :  { %5014 = vst [vmem:[#allocation10_spill] sm:$0xff] %v4429_v26  ;;  %v4431_v38 = vpop.f32.mrb[22].mxu1 }
 0x63b   :  { %v4433_v59 = vpop.f32.mrb[23].mxu1 }
 0x640   :  { %v1578_v20 = vpop.f32.mrb[24].mxu1 }
 0x641   :  { %v4441_v50 = vadd.f32 %v4438_v11, %v1578_v20  ;;  %v4443_v4 = vpop.f32.mrb[25].mxu1  ;;  %v4454_v47 = vpop.f32.mrb[16].mxu0  ;;  %v4957_v20 = vmov 3  }
 0x642   :  { %5016 = vst [vmem:[#allocation11_spill] sm:$0xff] %v4443_v4  ;;  %v1582_v56 = vpop.f32.mrb[26].mxu1  ;;  %v4458_v53 = vpop.f32.mrb[17].mxu0  ;;  %v5025_v4 = vmov 0  }
 0x643   :  { %5015 = vst [vmem:[#allocation20_spill] sm:$0xff] %v4441_v50  ;;  %v4446_v27 = vadd.f32 %v4438_v11, %v1582_v56  ;;  %v4448_v30 = vpop.f32.mrb[27].mxu1  ;;  %v4959_v56 = vmov 2  }
 0x644   :  { %5018 = vst [vmem:[#allocation12_spill] sm:$0xff] %v4448_v30 }
 0x645   :  { %5017 = vst [vmem:[#allocation21_spill] sm:$0xff] %v4446_v27 }
 0x648   :  { %v1145_v33 = vpop.xlane.xlu0 %1144  ;;  %v1588_v48 = vpop.f32.mrb[28].mxu1 }
 0x649   :  { %2929 = vrcp.f32 %v1145_v33  ;;  %v4452_v12 = vadd.f32 %v4438_v11, %v1588_v48  ;;  %v4456_v63 = vpop.f32.mrb[29].mxu1 }
 0x64a   :  { %5020 = vst [vmem:[#allocation13_spill] sm:$0xff] %v4456_v63  ;;  %v1592_v34 = vpop.f32.mrb[30].mxu1 }
 0x64b   :  { %5019 = vst [vmem:[#allocation22_spill] sm:$0xff] %v4452_v12  ;;  %v4461_v43 = vadd.f32 %v4438_v11, %v1592_v34 }
 0x64c   :  { %v1142_v22 = vpop.xlane.xlu0 %1141 }
 0x64d   :  { %2931 = vrcp.f32 %v1142_v22  ;;  %5021 = vst [vmem:[#allocation23_spill] sm:$0xff] %v4461_v43  ;;  %v4466_v22 = vpop.f32.mrb[31].mxu1 }
 0x64e   :  { %5022 = vst [vmem:[#allocation14_spill] sm:$0xff] %v4466_v22  ;;  %v5026_v22 = vmov 1  }
 0x650   :  { %v1151_v37 = vpop.xlane.xlu0 %1150 }
 0x651   :  { %2933 = vrcp.f32 %v1151_v37  ;;  %v4468_v37 = vpop.f32.mrb[32].mxu1 }
 0x653   :  { %v2930_v61 = vpop.eup %2929 }
 0x654   :  { %v1191_v7 = vmul.f32 %v2930_v61, %v4216_v1  ;;  %v1148_v18 = vpop.xlane.xlu0 %1147  ;;  %v4463_v1 = vpop.f32.mrb[18].mxu0 }
 0x655   :  { %2935 = vrcp.f32 %v1148_v18  ;;  %v4472_v61 = vpop.f32.mrb[33].mxu1  ;;  %v4474_v18 = vpop.f32.mrb[19].mxu0 }
 0x656   :  { %1947 = vperm.xlu0 %2748, %v1191_v7   ;;  %1837 = vperm.xlu1 %2747, %v1191_v7   ;;  %v4477_v48 = vpop.f32.mrb[34].mxu1 }
 0x657   :  { %v2932_v44 = vpop.eup %2931  ;;  %v4480_v34 = vpop.f32.mrb[35].mxu1 }
 0x658   :  { %v1189_v5 = vmul.f32 %v2932_v44, %v4227_v16  ;;  %v1169_v33 = vpop.xlane.xlu1 %1168 }
 0x659   :  { %2937 = vrcp.f32 %v1169_v33 }
 0x65a   :  { %2750 = vset.pattern.permute.xlu0 %v4957_v20  ;;  %2749 = vset.pattern.permute.xlu1 %v4959_v56 }
 0x65b   :  { %2679 = vmatprep.mubr.msk.f32.mxu0 %vm225_vm0, %v1189_v5  ;;  %2139 = vperm.xlu0 %2750, %v1191_v7   ;;  %v2934_v44 = vpop.eup %2933 }
 0x65c   :  { %2043 = vperm.xlu1 %2749, %v1191_v7   ;;  %2680 = vmatmul.mubr.msk.f32.vlgmr.msra.gmra.mrb[48].mxu0 %vm225_vm0, %v1191_v7  ;;  %v1166_v16 = vpop.xlane.xlu1 %1165  ;;  %v1195_v33 = vmul.f32 %v2934_v44, %v4238_v21  ;;  %v4493_v44 = vpop.f32.mrb[20].mxu0 }
 0x65d   :  { %2939 = vrcp.f32 %v1166_v16  ;;  %v5023_v16 = vmov 2   ;;  %v4498_v50 = vpop.f32.mrb[21].mxu0 }
 0x65f   :  { %v2936_v20 = vpop.eup %2935  ;;  %2751 = vset.pattern.permute.xlu0 %v4963_v0 }
 0x660   :  { %v4484_v56 = vmul.f32 %v2936_v20, %v4249_v55  ;;  %2752 = vset.pattern.permute.xlu1 %v4961_v42  ;;  %v1175_v12 = vpop.xlane.xlu1 %1174  ;;  %1832 = vperm.xlu0 %2751, %v1189_v5   ;;  %v5024_v55 = vmov 3  }
 0x661   :  { %1943 = vperm.xlu1 %2752, %v1189_v5   ;;  %v1157_v63 = vpop.xlane.xlu0 %1156 }
 0x662   :  { %2941 = vrcp.f32 %v1157_v63  ;;  %2682 = vmatprep.mubr.msk.f32.mxu0 %vm225_vm0, %v4484_v56 }
 0x663   :  { %2683 = vmatmul.mubr.msk.f32.gmra.mrb[50].mxu0 %vm225_vm0, %v1195_v33  ;;  %2943 = vrcp.f32 %v1175_v12  ;;  %v2938_v42 = vpop.eup %2937 }
 0x664   :  { %v1172_v7 = vpop.xlane.xlu1 %1171  ;;  %2753 = vset.pattern.permute.xlu0 %v5023_v16  ;;  %v4501_v12 = vmul.f32 %v2938_v42, %v4261_v14 }
 0x665   :  { %2945 = vrcp.f32 %v1172_v7  ;;  %2754 = vset.pattern.permute.xlu1 %v5024_v55  ;;  %2039 = vperm.xlu0 %2753, %v1189_v5   ;;  %v1154_v20 = vpop.xlane.xlu0 %1153  ;;  %v4503_v7 = vpop.f32.mrb[22].mxu0 }
 0x666   :  { %2135 = vperm.xlu1 %2754, %v1189_v5   ;;  %2947 = vrcp.f32 %v1154_v20  ;;  %v4508_v5 = vpop.f32.mrb[23].mxu0 }
 0x667   :  { %v2940_v21 = vpop.eup %2939 }
 0x668   :  { %v4496_v63 = vmul.f32 %v2940_v21, %v4273_v25  ;;  %v1181_v0 = vpop.xlane.xlu1 %1180  ;;  %v4515_v21 = vpop.f32.mrb[24].mxu0 }
 0x669   :  { %2051 = vperm.xlu0 %2753, %v1195_v33   ;;  %2949 = vrcp.f32 %v1181_v0  ;;  %v4517_v41 = vpop.f32.mrb[25].mxu0 }
 0x66a   :  { %2755 = vset.pattern.permute.xlu1 %v5025_v4  ;;  %2691 = vmatprep.mubr.msk.f32.mxu1 %vm225_vm0, %v4496_v63  ;;  %v4521_v54 = vpop.f32.mrb[26].mxu0 }
 0x66b   :  { %1847 = vperm.xlu1 %2755, %v1195_v33   ;;  %2692 = vmatmul.mubr.msk.f32.vlgmr.msra.gmra.mrb[48].mxu1 %vm225_vm0, %v4501_v12 }
 0x66c   :  { %v2942_v25 = vpop.eup %2941  ;;  %v1178_v20 = vpop.xlane.xlu1 %1177 }
 0x66d   :  { %v4513_v14 = vmul.f32 %v2942_v25, %v4303_v10  ;;  %2951 = vrcp.f32 %v1178_v20  ;;  %v1163_v42 = vpop.xlane.xlu0 %1162  ;;  %v2944_v26 = vpop.eup %2943 }
 0x66e   :  { %2953 = vrcp.f32 %v1163_v42  ;;  %v4526_v25 = vpop.f32.mrb[27].mxu0  ;;  %v4529_v20 = vmul.f32 %v2944_v26, %v4294_v62 }
 0x66f   :  { %v2946_v43 = vpop.eup %2945  ;;  %2756 = vset.pattern.permute.xlu1 %v5026_v22  ;;  %2059 = vperm.xlu0 %2753, %v4513_v14  }
 0x670   :  { %v2948_v15 = vpop.eup %2947  ;;  %v4524_v0 = vmul.f32 %v2946_v43, %v4312_v6  ;;  %1955 = vperm.xlu1 %2756, %v1195_v33   ;;  %v1184_v10 = vpop.xlane.xlu1 %1183 }
 0x671   :  { %v4532_v27 = vmul.f32 %v2948_v15, %v4322_v49  ;;  %2955 = vrcp.f32 %v1184_v10  ;;  %v1160_v30 = vpop.xlane.xlu0 %1159  ;;  %v4545_v15 = vpop.f32.mrb[36].mxu1 }
 0x672   :  { %2957 = vrcp.f32 %v1160_v30  ;;  %2694 = vmatprep.mubr.msk.f32.mxu1 %vm225_vm0, %v4524_v0  ;;  %5027 = vst [vmem:[#allocation24_spill] sm:$0xff] %v4545_v15  ;;  %v4550_v30 = vpop.f32.mrb[37].mxu1 }
 0x673   :  { %2695 = vmatmul.mubr.msk.f32.gmra.mrb[50].mxu1 %vm225_vm0, %v4529_v20  ;;  %2766 = vset.pattern.permute.xlu0 %v5026_v22  ;;  %v2950_v6 = vpop.eup %2949 }
 0x674   :  { %2757 = vset.pattern.permute.xlu1 %v5024_v55  ;;  %2685 = vmatprep.mubr.msk.f32.mxu0 %vm225_vm0, %v4532_v27  ;;  %v1187_v62 = vpop.xlane.xlu1 %1186 }
 0x675   :  { %2959 = vrcp.f32 %v1187_v62  ;;  %2147 = vperm.xlu1 %2757, %v1195_v33   ;;  %1959 = vperm.xlu0 %2766, %v4532_v27   ;;  %v4555_v33 = vmul.f32 %v2950_v6, %v4337_v19  ;;  %v4566_v62 = vpop.f32.mrb[28].mxu0 }
 0x676   :  { %2686 = vmatmul.mubr.msk.f32.gmra.mrb[52].mxu0 %vm225_vm0, %v4513_v14  ;;  %v4571_v6 = vpop.f32.mrb[29].mxu0 }
 0x677   :  { %v2952_v49 = vpop.eup %2951  ;;  %5028 = vst [vmem:[#allocation15_spill] sm:$0xff] %v4571_v6  ;;  %v4578_v15 = vpop.f32.mrb[30].mxu0 }
 0x678   :  { %v4548_v26 = vmul.f32 %v2952_v49, %v4356_v40  ;;  %v2954_v43 = vpop.eup %2953 }
 0x679   :  { %2758 = vset.pattern.permute.xlu1 %v5025_v4  ;;  %2768 = vset.pattern.permute.xlu0 %v5024_v55  ;;  %v4574_v49 = vmul.f32 %v2954_v43, %v4361_v2 }
 0x67a   :  { %1842 = vperm.xlu1 %2758, %v4484_v56   ;;  %2151 = vperm.xlu0 %2768, %v4532_v27  }
 0x67b   :  { %v2956_v42 = vpop.eup %2955  ;;  %2697 = vmatprep.mubr.msk.f32.mxu1 %vm225_vm0, %v4548_v26 }
 0x67c   :  { %v2958_v40 = vpop.eup %2957  ;;  %v4562_v10 = vmul.f32 %v2956_v42, %v4371_v58  ;;  %2698 = vmatmul.mubr.msk.f32.gmra.mrb[52].mxu1 %vm225_vm0, %v4555_v33  ;;  %v4583_v42 = vpop.f32.mrb[31].mxu0 }
 0x67d   :  { %v4569_v19 = vmul.f32 %v2958_v40, %v4342_v51  ;;  %v4607_v2 = vpop.f32.mrb[32].mxu0  ;;  %v4619_v40 = vpop.f32.mrb[38].mxu1 }
 0x67e   :  { %2759 = vset.pattern.permute.xlu1 %v5026_v22  ;;  %2771 = vset.pattern.permute.xlu0 %v5023_v16  ;;  %5029 = vst [vmem:[#allocation25_spill] sm:$0xff] %v4607_v2 }
 0x67f   :  { %v2960_v58 = vpop.eup %2959  ;;  %2700 = vmatprep.mubr.msk.f32.mxu1 %vm225_vm0, %v4562_v10  ;;  %1951 = vperm.xlu1 %2759, %v4484_v56  }
 0x680   :  { %v4586_v51 = vmul.f32 %v2960_v58, %v4383_v60  ;;  %2067 = vperm.xlu0 %2771, %v4574_v49   ;;  %2688 = vmatprep.mubr.msk.f32.mxu0 %vm225_vm0, %v4569_v19  ;;  %v4609_v60 = vpop.f32.mrb[33].mxu0  ;;  %v4621_v58 = vpop.f32.mrb[39].mxu1 }
 0x681   :  { %2689 = vmatmul.mubr.msk.f32.gmra.mrb[54].mxu0 %vm225_vm0, %v4574_v49  ;;  %5030 = vst [vmem:[#allocation16_spill] sm:$0xff] %v4609_v60  ;;  %v4612_v43 = vpop.f32.mrb[34].mxu0  ;;  %v4627_v60 = vpop.f32.mrb[40].mxu1 }
 0x682   :  { %2701 = vmatmul.mubr.msk.f32.gmra.mrb[54].mxu1 %vm225_vm0, %v4586_v51  ;;  %5031 = vst [vmem:[#allocation26_spill] sm:$0xff] %v4612_v43  ;;  %5033 = vst [vmem:[#allocation27_spill] sm:$0xff] %v4627_v60  ;;  %v4629_v2 = vpop.f32.mrb[41].mxu1 }
 0x683   :  { %2760 = vset.pattern.permute.xlu1 %v5023_v16  ;;  %5034 = vst [vmem:[#allocation18_spill] sm:$0xff] %v4629_v2 }
 0x684   :  { %2774 = vset.pattern.permute.xlu0 %v5026_v22  ;;  %2047 = vperm.xlu1 %2760, %v4484_v56  }
 0x685   :  { %1967 = vperm.xlu0 %2774, %v4569_v19  }
 0x688   :  { %2761 = vset.pattern.permute.xlu1 %v5024_v55 }
 0x689   :  { %2776 = vset.pattern.permute.xlu0 %v5024_v55  ;;  %2143 = vperm.xlu1 %2761, %v4484_v56   ;;  %v4616_v56 = vpop.f32.mrb[35].mxu0 }
 0x68a   :  { %2159 = vperm.xlu0 %2776, %v4569_v19   ;;  %5032 = vst [vmem:[#allocation17_spill] sm:$0xff] %v4616_v56 }
 0x68d   :  { %2762 = vset.pattern.permute.xlu1 %v5025_v4 }
 0x68e   :  { %2777 = vset.pattern.permute.xlu0 %v5025_v4  ;;  %1857 = vperm.xlu1 %2762, %v4513_v14  }
 0x68f   :  { %1877 = vperm.xlu0 %2777, %v4501_v12  }
 0x692   :  { %2763 = vset.pattern.permute.xlu1 %v5026_v22 }
 0x693   :  { %2779 = vset.pattern.permute.xlu0 %v5023_v16  ;;  %1963 = vperm.xlu1 %2763, %v4513_v14  }
 0x694   :  { %2075 = vperm.xlu0 %2779, %v4501_v12  }
 0x697   :  { %2764 = vset.pattern.permute.xlu1 %v5024_v55 }
 0x698   :  { %2782 = vset.pattern.permute.xlu0 %v5026_v22  ;;  %2155 = vperm.xlu1 %2764, %v4513_v14   ;;  %v4639_v14 = vpop.f32.mrb[36].mxu0 }
 0x699   :  { %1975 = vperm.xlu0 %2782, %v4496_v63   ;;  %5035 = vst [vmem:[#allocation28_spill] sm:$0xff] %v4639_v14  ;;  %v4641_v60 = vpop.f32.mrb[37].mxu0 }
 0x69a   :  { %5036 = vst [vmem:[#allocation29_spill] sm:$0xff] %v4641_v60  ;;  %v4644_v2 = vpop.f32.mrb[38].mxu0 }
 0x69b   :  { %5037 = vst [vmem:[#allocation30_spill] sm:$0xff] %v4644_v2  ;;  %v4648_v56 = vpop.f32.mrb[39].mxu0 }
 0x69c   :  { %2765 = vset.pattern.permute.xlu1 %v5025_v4  ;;  %5038 = vst [vmem:[#allocation31_spill] sm:$0xff] %v4648_v56  ;;  %v4651_v43 = vpop.f32.mrb[40].mxu0 }
 0x69d   :  { %2784 = vset.pattern.permute.xlu0 %v5024_v55  ;;  %1852 = vperm.xlu1 %2765, %v4532_v27   ;;  %5039 = vst [vmem:[#allocation32_spill] sm:$0xff] %v4651_v43 }
 0x69e   :  { %2167 = vperm.xlu0 %2784, %v4496_v63  }
 0x6a1   :  { %2767 = vset.pattern.permute.xlu1 %v5023_v16 }
 0x6a2   :  { %2785 = vset.pattern.permute.xlu0 %v5025_v4  ;;  %2055 = vperm.xlu1 %2767, %v4532_v27   ;;  %v4653_v27 = vpop.f32.mrb[41].mxu0 }
 0x6a3   :  { %1887 = vperm.xlu0 %2785, %v4529_v20   ;;  %5040 = vst [vmem:[#allocation33_spill] sm:$0xff] %v4653_v27  ;;  %v4655_v6 = vpop.f32.mrb[42].mxu0 }
 0x6a4   :  { %5041 = vst [vmem:[#allocation34_spill] sm:$0xff] %v4655_v6  ;;  %v4658_v60 = vpop.f32.mrb[43].mxu0 }
 0x6a5   :  { %5042 = vst [vmem:[#allocation35_spill] sm:$0xff] %v4658_v60  ;;  %v4662_v14 = vpop.f32.mrb[44].mxu0 }
 0x6a6   :  { %2769 = vset.pattern.permute.xlu1 %v5025_v4  ;;  %5043 = vst [vmem:[#allocation36_spill] sm:$0xff] %v4662_v14  ;;  %v4665_v56 = vpop.f32.mrb[45].mxu0 }
 0x6a7   :  { %2787 = vset.pattern.permute.xlu0 %v5023_v16  ;;  %1867 = vperm.xlu1 %2769, %v4574_v49   ;;  %5044 = vst [vmem:[#allocation37_spill] sm:$0xff] %v4665_v56  ;;  %v4667_v2 = vpop.f32.mrb[46].mxu0  ;;  %v4680_v56 = vpop.f32.mrb[42].mxu1 }
 0x6a8   :  { %2083 = vperm.xlu0 %2787, %v4529_v20   ;;  %5045 = vst [vmem:[#allocation38_spill] sm:$0xff] %v4667_v2  ;;  %v4669_v43 = vpop.f32.mrb[47].mxu0  ;;  %v4684_v14 = vpop.f32.mrb[43].mxu1 }
 0x6a9   :  { %5046 = vst [vmem:[#allocation39_spill] sm:$0xff] %v4669_v43 }
 0x6ab   :  { %2770 = vset.pattern.permute.xlu1 %v5026_v22 }
 0x6ac   :  { %2790 = vset.pattern.permute.xlu0 %v5026_v22  ;;  %1971 = vperm.xlu1 %2770, %v4574_v49  }
 0x6ad   :  { %1983 = vperm.xlu0 %2790, %v4524_v0  }
 0x6b0   :  { %2772 = vset.pattern.permute.xlu1 %v5024_v55 }
 0x6b1   :  { %2792 = vset.pattern.permute.xlu0 %v5024_v55  ;;  %2163 = vperm.xlu1 %2772, %v4574_v49   ;;  %v4687_v49 = vpop.f32.mrb[44].mxu1 }
 0x6b2   :  { %2175 = vperm.xlu0 %2792, %v4524_v0   ;;  %5047 = vst [vmem:[#allocation40_spill] sm:$0xff] %v4687_v49  ;;  %v4689_v43 = vpop.f32.mrb[45].mxu1 }
 0x6b3   :  { %5048 = vst [vmem:[#allocation41_spill] sm:$0xff] %v4689_v43  ;;  %v4691_v2 = vpop.f32.mrb[46].mxu1 }
 0x6b4   :  { %5049 = vst [vmem:[#allocation42_spill] sm:$0xff] %v4691_v2  ;;  %v4694_v27 = vpop.f32.mrb[47].mxu1 }
 0x6b5   :  { %2773 = vset.pattern.permute.xlu1 %v5025_v4  ;;  %5050 = vst [vmem:[#allocation43_spill] sm:$0xff] %v4694_v27 }
 0x6b6   :  { %2793 = vset.pattern.permute.xlu0 %v5025_v4  ;;  %1862 = vperm.xlu1 %2773, %v4569_v19  }
 0x6b7   :  { %1897 = vperm.xlu0 %2793, %v4555_v33  }
 0x6ba   :  { %2775 = vset.pattern.permute.xlu1 %v5023_v16 }
 0x6bb   :  { %2795 = vset.pattern.permute.xlu0 %v5023_v16  ;;  %2063 = vperm.xlu1 %2775, %v4569_v19  }
 0x6bc   :  { %2091 = vperm.xlu0 %2795, %v4555_v33  }
 0x6bf   :  { %2778 = vset.pattern.permute.xlu1 %v5026_v22 }
 0x6c0   :  { %2798 = vset.pattern.permute.xlu0 %v5026_v22  ;;  %1979 = vperm.xlu1 %2778, %v4501_v12  }
 0x6c1   :  { %1991 = vperm.xlu0 %2798, %v4548_v26  }
 0x6c4   :  { %2780 = vset.pattern.permute.xlu1 %v5024_v55 }
 0x6c5   :  { %2800 = vset.pattern.permute.xlu0 %v5024_v55  ;;  %2171 = vperm.xlu1 %2780, %v4501_v12   ;;  %v1815_v12 = vadd.f32 %v4438_v11, %v4391_v52 }
 0x6c6   :  { %2183 = vperm.xlu0 %2800, %v4548_v26  }
 0x6c9   :  { %2781 = vset.pattern.permute.xlu1 %v5025_v4 }
 0x6ca   :  { %2801 = vset.pattern.permute.xlu0 %v5025_v4  ;;  %1872 = vperm.xlu1 %2781, %v4496_v63  }
 0x6cb   :  { %1907 = vperm.xlu0 %2801, %v4586_v51  }
 0x6ce   :  { %2783 = vset.pattern.permute.xlu1 %v5023_v16 }
 0x6cf   :  { %2803 = vset.pattern.permute.xlu0 %v5023_v16  ;;  %2071 = vperm.xlu1 %2783, %v4496_v63  }
 0x6d0   :  { %2099 = vperm.xlu0 %2803, %v4586_v51  }
 0x6d3   :  { %2786 = vset.pattern.permute.xlu1 %v5026_v22 }
 0x6d4   :  { %2805 = vset.pattern.permute.xlu0 %v5026_v22  ;;  %1987 = vperm.xlu1 %2786, %v4529_v20  }
 0x6d5   :  { %1999 = vperm.xlu0 %2805, %v4562_v10   ;;  %v1838_v19 = vpop.permute.xlu1 %1837  ;;  %v1948_v2 = vpop.permute.xlu0 %1947 }
 0x6d6   :  { %v1911_v49 = vmul.f32 %v1838_v19, %v4393_v39  ;;  %v2007_v63 = vmul.f32 %v1948_v2, %v4463_v1  ;;  %v1814_v39 = vadd.f32 %v4438_v11, %v4387_v45 }
 0x6d8   :  { %v1927_v43 = vadd.f32 %v1911_v49, %v1815_v12  ;;  %2788 = vset.pattern.permute.xlu1 %v5024_v55 }
 0x6d9   :  { %2807 = vset.pattern.permute.xlu0 %v5024_v55  ;;  %2179 = vperm.xlu1 %2788, %v4529_v20  }
 0x6da   :  { %v2023_v52 = vadd.f32 %v2007_v63, %v1927_v43  ;;  %2191 = vperm.xlu0 %2807, %v4562_v10   ;;  %v2140_v27 = vpop.permute.xlu0 %2139 }
 0x6db   :  { %v2044_v60 = vpop.permute.xlu1 %2043  ;;  %v2199_v1 = vmul.f32 %v2140_v27, %v4480_v34 }
 0x6dc   :  { %v2103_v6 = vmul.f32 %v2044_v60, %v4474_v18 }
 0x6dd   :  { %2789 = vset.pattern.permute.xlu1 %v5025_v4 }
 0x6de   :  { %v2119_v49 = vadd.f32 %v2103_v6, %v2023_v52  ;;  %1882 = vperm.xlu1 %2789, %v4524_v0  }
 0x6df   :  { %v1833_v2 = vpop.permute.xlu0 %1832 }
 0x6e0   :  { %v1944_v12 = vpop.permute.xlu1 %1943  ;;  %v1910_v20 = vmul.f32 %v1833_v2, %v4389_v57  ;;  %v4730_v43 = vadd.f32 %v2199_v1, %v2119_v49  ;;  %v1817_v57 = vadd.f32 %v4438_v11, %v4399_v28 }
 0x6e1   :  { %v2006_v19 = vmul.f32 %v1944_v12, %v4454_v47 }
 0x6e2   :  { %v1926_v63 = vadd.f32 %v1910_v20, %v1814_v39  ;;  %2791 = vset.pattern.permute.xlu1 %v5023_v16 }
 0x6e3   :  { %2079 = vperm.xlu1 %2791, %v4524_v0  }
 0x6e4   :  { %v2022_v18 = vadd.f32 %v2006_v19, %v1926_v63  ;;  %v2040_v45 = vpop.permute.xlu0 %2039 }
 0x6e5   :  { %v2136_v6 = vpop.permute.xlu1 %2135  ;;  %v2102_v34 = vmul.f32 %v2040_v45, %v4458_v53 }
 0x6e6   :  { %v2198_v60 = vmul.f32 %v2136_v6, %v4472_v61 }
 0x6e7   :  { %v2118_v27 = vadd.f32 %v2102_v34, %v2022_v18  ;;  %2794 = vset.pattern.permute.xlu1 %v5026_v22 }
 0x6e8   :  { %1995 = vperm.xlu1 %2794, %v4555_v33   ;;  %v2052_v52 = vpop.permute.xlu0 %2051 }
 0x6e9   :  { %v4741_v47 = vadd.f32 %v2198_v60, %v2118_v27  ;;  %v2105_v2 = vmul.f32 %v2052_v52, %v4508_v5 }
 0x6ea   :  { %v1848_v39 = vpop.permute.xlu1 %1847 }
 0x6eb   :  { %v1913_v0 = vmul.f32 %v1848_v39, %v4401_v31 }
 0x6ec   :  { %2796 = vset.pattern.permute.xlu1 %v5024_v55 }
 0x6ed   :  { %v1929_v49 = vadd.f32 %v1913_v0, %v1817_v57  ;;  %2187 = vperm.xlu1 %2796, %v4555_v33  }
 0x6ee   :  { %v2060_v53 = vpop.permute.xlu0 %2059 }
 0x6ef   :  { %v1956_v61 = vpop.permute.xlu1 %1955 }
 0x6f0   :  { %v2009_v1 = vmul.f32 %v1956_v61, %v4503_v7  ;;  %v1816_v7 = vadd.f32 %v4438_v11, %v4395_v32 }
 0x6f1   :  { %2797 = vset.pattern.permute.xlu1 %v5025_v4 }
 0x6f2   :  { %v2025_v28 = vadd.f32 %v2009_v1, %v1929_v49  ;;  %1892 = vperm.xlu1 %2797, %v4548_v26   ;;  %v2107_v1 = vmul.f32 %v2060_v53, %v4526_v25  ;;  %v1825_v53 = vadd.f32 %v4438_v11, %v4431_v38 }
 0x6f4   :  { %v2148_v12 = vpop.permute.xlu1 %2147  ;;  %v1960_v20 = vpop.permute.xlu0 %1959  ;;  %v2121_v19 = vadd.f32 %v2105_v2, %v2025_v28 }
 0x6f5   :  { %v2201_v31 = vmul.f32 %v4477_v48, %v2148_v12 }
 0x6f6   :  { %2799 = vset.pattern.permute.xlu1 %v5023_v16 }
 0x6f7   :  { %2087 = vperm.xlu1 %2799, %v4548_v26   ;;  %v4753_v33 = vadd.f32 %v2201_v31, %v2121_v19 }
 0x6f9   :  { %v1843_v63 = vpop.permute.xlu1 %1842  ;;  %v2152_v18 = vpop.permute.xlu0 %2151 }
 0x6fa   :  { %v1912_v5 = vmul.f32 %v1843_v63, %v4397_v13 }
 0x6fb   :  { %2802 = vset.pattern.permute.xlu1 %v5026_v22 }
 0x6fc   :  { %v1928_v45 = vadd.f32 %v1912_v5, %v1816_v7  ;;  %2003 = vperm.xlu1 %2802, %v4586_v51   ;;  %v2010_v7 = vmul.f32 %v1960_v20, %v4515_v21 }
 0x6fe   :  { %v1952_v6 = vpop.permute.xlu1 %1951 }
 0x6ff   :  { %v2008_v48 = vmul.f32 %v1952_v6, %v4493_v44  ;;  %v2068_v34 = vpop.permute.xlu0 %2067 }
 0x700   :  { %2804 = vset.pattern.permute.xlu1 %v5025_v4 }
 0x701   :  { %v2024_v26 = vadd.f32 %v2008_v48, %v1928_v45  ;;  %1902 = vperm.xlu1 %2804, %v4562_v10  }
 0x703   :  { %v2048_v60 = vpop.permute.xlu1 %2047 }
 0x704   :  { %v2104_v32 = vmul.f32 %v2048_v60, %v4498_v50  ;;  %v4764_v27 = vpop.permute.xlu0 %1967  ;;  %v1819_v50 = vadd.f32 %v4438_v11, %v4407_v24 }
 0x705   :  { %2806 = vset.pattern.permute.xlu1 %v5023_v16  ;;  %v1823_v16 = vadd.f32 %v4438_v11, %v4423_v46 }
 0x706   :  { %v2120_v13 = vadd.f32 %v2104_v32, %v2024_v26  ;;  %2095 = vperm.xlu1 %2806, %v4562_v10  }
 0x708   :  { %v2144_v22 = vpop.permute.xlu1 %2143 }
 0x709   :  { %v2200_v57 = vmul.f32 %v4468_v37, %v2144_v22  ;;  %v4769_v44 = vpop.permute.xlu0 %2159 }
 0x70a   :  { %2808 = vset.pattern.permute.xlu1 %v5024_v55 }
 0x70b   :  { %2195 = vperm.xlu1 %2808, %v4586_v51   ;;  %v4773_v4 = vadd.f32 %v2200_v57, %v2120_v13 }
 0x70d   :  { %v1858_v52 = vpop.permute.xlu1 %1857 }
 0x70e   :  { %v1915_v10 = vmul.f32 %v1858_v52, %v4409_v3  ;;  %v1878_v39 = vpop.permute.xlu0 %1877 }
 0x70f   :  { %v1919_v37 = vmul.f32 %v1878_v39, %v4425_v35  ;;  %v1818_v35 = vadd.f32 %v4438_v11, %v4403_v17  ;;  %v2202_v17 = vmul.f32 %v2152_v18, %v4550_v30  ;;  %v2109_v30 = vmul.f32 %v2068_v34, %v4583_v42 }
 0x710   :  { %v1931_v0 = vadd.f32 %v1915_v10, %v1819_v50  ;;  %v1820_v42 = vadd.f32 %v4438_v11, %v4411_v36 }
 0x711   :  { %v4781_v49 = vadd.f32 %v1919_v37, %v1823_v16 }
 0x712   :  { %v1964_v55 = vpop.permute.xlu1 %1963 }
 0x713   :  { %v2011_v51 = vmul.f32 %v1964_v55, %v4521_v54  ;;  %v4784_v61 = vpop.permute.xlu0 %2075 }
 0x715   :  { %v2027_v24 = vadd.f32 %v2011_v51, %v1931_v0  ;;  %v5051_v0 = vld [vmem:[#allocation12_spill] sm:$0xff] }
 0x717   :  { %v2156_v2 = vpop.permute.xlu1 %2155  ;;  %v2123_v28 = vadd.f32 %v2107_v1, %v2027_v24 }
 0x718   :  { %v2203_v46 = vmul.f32 %v2156_v2, %v4621_v58  ;;  %v4788_v12 = vpop.permute.xlu0 %1975  ;;  %v5052_v2 = vld [vmem:[#allocation21_spill] sm:$0xff] }
 0x71a   :  { %v4790_v3 = vadd.f32 %v2203_v46, %v2123_v28  ;;  %v5053_v46 = vld [vmem:[#allocation15_spill] sm:$0xff] }
 0x71c   :  { %v1853_v19 = vpop.permute.xlu1 %1852 }
 0x71d   :  { %v1914_v31 = vmul.f32 %v1853_v19, %v4405_v23  ;;  %v4795_v54 = vpop.permute.xlu0 %2167  ;;  %v1821_v23 = vadd.f32 %v4438_v11, %v4415_v8 }
 0x71f   :  { %v1930_v25 = vadd.f32 %v1914_v31, %v1818_v35 }
 0x721   :  { %v2056_v63 = vpop.permute.xlu1 %2055  ;;  %v2026_v58 = vadd.f32 %v2010_v7, %v1930_v25 }
 0x722   :  { %v2106_v5 = vmul.f32 %v2056_v63, %v4517_v41  ;;  %v1888_v45 = vpop.permute.xlu0 %1887 }
 0x723   :  { %v1921_v6 = vmul.f32 %v1888_v45, %v4433_v59 }
 0x724   :  { %v2122_v48 = vadd.f32 %v2106_v5, %v2026_v58  ;;  %v5056_v5 = vld [vmem:[#allocation17_spill] sm:$0xff] }
 0x725   :  { %v4805_v26 = vadd.f32 %v1921_v6, %v1825_v53  ;;  %v2111_v45 = vmul.f32 %v4784_v61, %v5056_v5 }
 0x726   :  { %v1868_v21 = vpop.permute.xlu1 %1867  ;;  %v4807_v20 = vadd.f32 %v2202_v17, %v2122_v48 }
 0x727   :  { %v1917_v38 = vmul.f32 %v1868_v21, %v4417_v29  ;;  %v4810_v60 = vpop.permute.xlu0 %2083 }
 0x729   :  { %v1933_v32 = vadd.f32 %v1917_v38, %v1821_v23 }
 0x72b   :  { %v1972_v41 = vpop.permute.xlu1 %1971 }
 0x72c   :  { %v2013_v13 = vmul.f32 %v1972_v41, %v4578_v15  ;;  %v4813_v59 = vpop.permute.xlu0 %1983 }
 0x72e   :  { %v2029_v18 = vadd.f32 %v2013_v13, %v1933_v32 }
 0x72f   :  { %v2681_v22 = vpop.f32.mrb[48].mxu0 }
 0x730   :  { %v2413_v8 = vadd.f32 %v2681_v22, %v4730_v43  ;;  %v2333_v57 = vpop.f32.mrb[49].mxu0  ;;  %v2164_v50 = vpop.permute.xlu1 %2163  ;;  %v2125_v16 = vadd.f32 %v2109_v30, %v2029_v18  ;;  %v5057_v18 = vld [vmem:[#allocation8_spill] sm:$0xff] }
 0x731   :  { %v2412_v52 = vadd.f32 %v2333_v57, %v4741_v47  ;;  %v2205_v29 = vmul.f32 %v4619_v40, %v2164_v50  ;;  %v4819_v10 = vpop.permute.xlu0 %2175  ;;  %v2012_v40 = vmul.f32 %v4764_v27, %v4566_v62  ;;  %v1822_v22 = vadd.f32 %v4438_v11, %v5057_v18  ;;  %v5058_v57 = vld [vmem:[#allocation9_spill] sm:$0xff] }
 0x732   :  { %2429 = vst [vmem:[#allocation5 + $0x8] sm:$0xff] %v2413_v8 }
 0x733   :  { %2428 = vst [vmem:[#allocation5] sm:$0xff] %v2412_v52  ;;  %v4821_v15 = vadd.f32 %v2205_v29, %v2125_v16  ;;  %v5059_v16 = vld [vmem:[#allocation14_spill] sm:$0xff]  ;;  %v5060_v29 = vld [vmem:[#allocation25_spill] sm:$0xff] }
 0x735   :  { %v1863_v34 = vpop.permute.xlu1 %1862 }
 0x736   :  { %v1916_v39 = vmul.f32 %v1863_v34, %v4413_v9  ;;  %v1898_v43 = vpop.permute.xlu0 %1897  ;;  %v2684_v37 = vpop.f32.mrb[50].mxu0 }
 0x737   :  { %v1923_v55 = vmul.f32 %v1898_v43, %v5051_v0  ;;  %v2415_v47 = vadd.f32 %v2684_v37, %v4753_v33  ;;  %v2343_v51 = vpop.f32.mrb[51].mxu0  ;;  %v5054_v33 = vld [vmem:[#allocation24_spill] sm:$0xff] }
 0x738   :  { %v1932_v1 = vadd.f32 %v1916_v39, %v1820_v42  ;;  %v2414_v24 = vadd.f32 %v2343_v51, %v4773_v4  ;;  %v2204_v31 = vmul.f32 %v5054_v33, %v4769_v44  ;;  %v5055_v4 = vld [vmem:[#allocation26_spill] sm:$0xff]  ;;  %v2014_v42 = vmul.f32 %v4788_v12, %v5060_v29  ;;  %v5061_v39 = vld [vmem:[#allocation23_spill] sm:$0xff]  ;;  %v5062_v0 = vld [vmem:[#allocation16_spill] sm:$0xff] }
 0x739   :  { %v4832_v28 = vadd.f32 %v1923_v55, %v5052_v2  ;;  %2431 = vst [vmem:[#allocation5 + $0x18] sm:$0xff] %v2415_v47  ;;  %v5073_v29 = vld [vmem:[#allocation43_spill] sm:$0xff] }
 0x73a   :  { %2430 = vst [vmem:[#allocation5 + $0x10] sm:$0xff] %v2414_v24  ;;  %v2064_v36 = vpop.permute.xlu1 %2063  ;;  %v2028_v9 = vadd.f32 %v2012_v40, %v1932_v1  ;;  %v5063_v40 = vld [vmem:[#allocation18_spill] sm:$0xff] }
 0x73b   :  { %v2108_v35 = vmul.f32 %v2064_v36, %v5053_v46  ;;  %v4835_v19 = vpop.permute.xlu0 %2091  ;;  %v5064_v36 = vld [vmem:[#allocation30_spill] sm:$0xff] }
 0x73d   :  { %v2124_v7 = vadd.f32 %v2108_v35, %v2028_v9 }
 0x73e   :  { %v2693_v25 = vpop.f32.mrb[48].mxu1 }
 0x73f   :  { %v1980_v62 = vpop.permute.xlu1 %1979  ;;  %v2373_v27 = vpop.f32.mrb[49].mxu1  ;;  %v2220_v53 = vadd.f32 %v2204_v31, %v2124_v7  ;;  %v5065_v7 = vld [vmem:[#allocation31_spill] sm:$0xff] }
 0x740   :  { %v2015_v63 = vmul.f32 %v1980_v62, %v5055_v4  ;;  %v4840_v58 = vpop.permute.xlu0 %1991 }
 0x742   :  { %v2031_v6 = vadd.f32 %v2015_v63, %v4781_v49 }
 0x744   :  { %v2172_v17 = vpop.permute.xlu1 %2171  ;;  %v2127_v48 = vadd.f32 %v2111_v45, %v2031_v6 }
 0x745   :  { %v2207_v23 = vmul.f32 %v2172_v17, %v4684_v14  ;;  %v4846_v21 = vpop.permute.xlu0 %2183  ;;  %v5066_v17 = vld [vmem:[#allocation19_spill] sm:$0xff] }
 0x746   :  { %v2696_v44 = vpop.f32.mrb[50].mxu1 }
 0x747   :  { %v2223_v38 = vadd.f32 %v2207_v23, %v2127_v48  ;;  %v2383_v32 = vpop.f32.mrb[51].mxu1  ;;  %v1824_v48 = vadd.f32 %v4438_v11, %v5066_v17  ;;  %v5067_v23 = vld [vmem:[#allocation10_spill] sm:$0xff] }
 0x749   :  { %v2421_v41 = vadd.f32 %v2693_v25, %v2223_v38  ;;  %v2687_v13 = vpop.f32.mrb[52].mxu0  ;;  %v1873_v30 = vpop.permute.xlu1 %1872  ;;  %v2113_v25 = vmul.f32 %v4810_v60, %v5065_v7  ;;  %v5080_v7 = vld [vmem:[#allocation39_spill] sm:$0xff] }
 0x74a   :  { %v2417_v8 = vadd.f32 %v2687_v13, %v4790_v3  ;;  %v2353_v61 = vpop.f32.mrb[53].mxu0  ;;  %v1918_v49 = vmul.f32 %v1873_v30, %v5058_v57  ;;  %v1908_v50 = vpop.permute.xlu0 %1907  ;;  %v5069_v30 = vld [vmem:[#allocation29_spill] sm:$0xff]  ;;  %v5071_v57 = vld [vmem:[#allocation34_spill] sm:$0xff] }
 0x74b   :  { %2437 = vst [vmem:[#allocation5 + $0x48] sm:$0xff] %v2421_v41  ;;  %v2416_v14 = vadd.f32 %v2353_v61, %v4807_v20  ;;  %v1925_v52 = vmul.f32 %v1908_v50, %v5059_v16  ;;  %v2206_v20 = vmul.f32 %v4795_v54, %v5063_v40  ;;  %v5072_v50 = vld [vmem:[#allocation35_spill] sm:$0xff] }
 0x74c   :  { %2433 = vst [vmem:[#allocation5 + $0x28] sm:$0xff] %v2417_v8  ;;  %v1934_v34 = vadd.f32 %v1918_v49, %v1822_v22  ;;  %v5070_v22 = vld [vmem:[#allocation27_spill] sm:$0xff] }
 0x74d   :  { %2432 = vst [vmem:[#allocation5 + $0x20] sm:$0xff] %v2416_v14  ;;  %v4857_v43 = vadd.f32 %v1925_v52, %v5061_v39  ;;  %v2115_v14 = vmul.f32 %v4835_v19, %v5072_v50 }
 0x74e   :  { %v2072_v37 = vpop.permute.xlu1 %2071  ;;  %v2030_v3 = vadd.f32 %v2014_v42, %v1934_v34 }
 0x74f   :  { %v2110_v55 = vmul.f32 %v2072_v37, %v5062_v0  ;;  %v2699_v47 = vpop.f32.mrb[52].mxu1  ;;  %v5075_v0 = vld [vmem:[#allocation32_spill] sm:$0xff] }
 0x750   :  { %v2393_v51 = vpop.f32.mrb[53].mxu1 }
 0x751   :  { %v2126_v1 = vadd.f32 %v2110_v55, %v2030_v3  ;;  %v2018_v55 = vmul.f32 %v4840_v58, %v5075_v0 }
 0x753   :  { %v2222_v24 = vadd.f32 %v2206_v20, %v2126_v1  ;;  %v1988_v2 = vpop.permute.xlu1 %1987  ;;  %v5077_v1 = vld [vmem:[#allocation33_spill] sm:$0xff] }
 0x754   :  { %v2017_v12 = vmul.f32 %v1988_v2, %v5064_v36  ;;  %v2690_v9 = vpop.f32.mrb[54].mxu0  ;;  %v2100_v36 = vpop.permute.xlu0 %2099 }
 0x755   :  { %v2420_v46 = vadd.f32 %v2373_v27, %v2222_v24  ;;  %v2419_v35 = vadd.f32 %v2690_v9, %v4821_v15  ;;  %v2363_v33 = vpop.f32.mrb[55].mxu0  ;;  %v4864_v31 = vpop.f32.mrb[54].mxu1  ;;  %v5078_v24 = vld [vmem:[#allocation41_spill] sm:$0xff] }
 0x756   :  { %v2033_v62 = vadd.f32 %v2017_v12, %v4805_v26  ;;  %v2418_v4 = vadd.f32 %v2363_v33, %v2220_v53  ;;  %v4869_v63 = vpop.f32.mrb[55].mxu1  ;;  %v5068_v26 = vld [vmem:[#allocation28_spill] sm:$0xff]  ;;  %v2210_v2 = vmul.f32 %v4846_v21, %v5078_v24  ;;  %v5083_v21 = vld [vmem:[#allocation22_spill] sm:$0xff] }
 0x757   :  { %2436 = vst [vmem:[#allocation5 + $0x40] sm:$0xff] %v2420_v46  ;;  %2435 = vst [vmem:[#allocation5 + $0x38] sm:$0xff] %v2419_v35  ;;  %v2016_v53 = vmul.f32 %v4813_v59, %v5068_v26  ;;  %v5079_v46 = vld [vmem:[#allocation38_spill] sm:$0xff] }
 0x758   :  { %2434 = vst [vmem:[#allocation5 + $0x30] sm:$0xff] %v2418_v4  ;;  %v2180_v54 = vpop.permute.xlu1 %2179  ;;  %v2129_v5 = vadd.f32 %v2113_v25, %v2033_v62  ;;  %v2117_v25 = vmul.f32 %v2100_v36, %v5080_v7  ;;  %v2000_v62 = vpop.permute.xlu0 %1999 }
 0x759   :  { %v2209_v27 = vmul.f32 %v4680_v56, %v2180_v54  ;;  %v2208_v56 = vmul.f32 %v5070_v22, %v4819_v10  ;;  %v5074_v10 = vld [vmem:[#allocation11_spill] sm:$0xff] }
 0x75b   :  { %v2225_v45 = vadd.f32 %v2209_v27, %v2129_v5  ;;  %v5081_v5 = vld [vmem:[#allocation13_spill] sm:$0xff] }
 0x75c   :  { %v2192_v17 = vpop.permute.xlu0 %2191 }
 0x75d   :  { %v2423_v15 = vadd.f32 %v2696_v44, %v2225_v45  ;;  %v1883_v6 = vpop.permute.xlu1 %1882  ;;  %v5082_v45 = vld [vmem:[#allocation36_spill] sm:$0xff] }
 0x75e   :  { %v1920_v60 = vmul.f32 %v1883_v6, %v5067_v23 }
 0x75f   :  { %2439 = vst [vmem:[#allocation5 + $0x58] sm:$0xff] %v2423_v15  ;;  %v2020_v15 = vmul.f32 %v2000_v62, %v5082_v45 }
 0x760   :  { %v1936_v38 = vadd.f32 %v1920_v60, %v1824_v48  ;;  %v5084_v60 = vld [vmem:[#allocation37_spill] sm:$0xff] }
 0x762   :  { %v2080_v41 = vpop.permute.xlu1 %2079  ;;  %v2032_v13 = vadd.f32 %v2016_v53, %v1936_v38 }
 0x763   :  { %v2112_v18 = vmul.f32 %v2080_v41, %v5069_v30 }
 0x765   :  { %v2128_v8 = vadd.f32 %v2112_v18, %v2032_v13  ;;  %v5086_v13 = vld [vmem:[#allocation42_spill] sm:$0xff] }
 0x767   :  { %v2224_v44 = vadd.f32 %v2208_v56, %v2128_v8  ;;  %v1996_v61 = vpop.permute.xlu1 %1995 }
 0x768   :  { %v2019_v49 = vmul.f32 %v1996_v61, %v5071_v57 }
 0x769   :  { %v2422_v11 = vadd.f32 %v2383_v32, %v2224_v44  ;;  %v5076_v32 = vld [vmem:[#allocation20_spill] sm:$0xff] }
 0x76a   :  { %v2035_v16 = vadd.f32 %v2019_v49, %v4832_v28 }
 0x76b   :  { %2438 = vst [vmem:[#allocation5 + $0x50] sm:$0xff] %v2422_v11 }
 0x76c   :  { %v2188_v59 = vpop.permute.xlu1 %2187  ;;  %v2131_v52 = vadd.f32 %v2115_v14, %v2035_v16 }
 0x76d   :  { %v2211_v42 = vmul.f32 %v2188_v59, %v5073_v29 }
 0x76f   :  { %v2227_v34 = vadd.f32 %v2211_v42, %v2131_v52 }
 0x771   :  { %v2425_v39 = vadd.f32 %v2699_v47, %v2227_v34  ;;  %v1893_v37 = vpop.permute.xlu1 %1892 }
 0x772   :  { %v1922_v3 = vmul.f32 %v1893_v37, %v5074_v10 }
 0x773   :  { %2441 = vst [vmem:[#allocation5 + $0x68] sm:$0xff] %v2425_v39 }
 0x774   :  { %v1938_v40 = vadd.f32 %v1922_v3, %v5076_v32 }
 0x776   :  { %v2088_v20 = vpop.permute.xlu1 %2087  ;;  %v2034_v19 = vadd.f32 %v2018_v55, %v1938_v40 }
 0x777   :  { %v2114_v28 = vmul.f32 %v2088_v20, %v5077_v1 }
 0x779   :  { %v2130_v12 = vadd.f32 %v2114_v28, %v2034_v19 }
 0x77b   :  { %v2226_v9 = vadd.f32 %v2210_v2, %v2130_v12  ;;  %v2004_v47 = vpop.permute.xlu1 %2003 }
 0x77c   :  { %v2021_v35 = vmul.f32 %v2004_v47, %v5079_v46 }
 0x77d   :  { %v2424_v33 = vadd.f32 %v2393_v51, %v2226_v9  ;;  %v5085_v51 = vld [vmem:[#allocation40_spill] sm:$0xff] }
 0x77e   :  { %v2037_v58 = vadd.f32 %v2021_v35, %v4857_v43  ;;  %v2212_v53 = vmul.f32 %v5085_v51, %v2192_v17 }
 0x77f   :  { %2440 = vst [vmem:[#allocation5 + $0x60] sm:$0xff] %v2424_v33 }
 0x780   :  { %v1903_v4 = vpop.permute.xlu1 %1902  ;;  %v2133_v54 = vadd.f32 %v2117_v25, %v2037_v58 }
 0x781   :  { %v1924_v27 = vmul.f32 %v1903_v4, %v5081_v5 }
 0x783   :  { %v1940_v6 = vadd.f32 %v1924_v27, %v5083_v21 }
 0x785   :  { %v2096_v48 = vpop.permute.xlu1 %2095  ;;  %v2036_v23 = vadd.f32 %v2020_v15, %v1940_v6 }
 0x786   :  { %v2116_v26 = vmul.f32 %v2096_v48, %v5084_v60 }
 0x788   :  { %v2132_v38 = vadd.f32 %v2116_v26, %v2036_v23 }
 0x78a   :  { %v2228_v41 = vadd.f32 %v2212_v53, %v2132_v38  ;;  %v2196_v43 = vpop.permute.xlu1 %2195 }
 0x78b   :  { %v2213_v30 = vmul.f32 %v5086_v13, %v2196_v43 }
 0x78c   :  { %v2426_v18 = vadd.f32 %v4869_v63, %v2228_v41 }
 0x78d   :  { %v2229_v22 = vadd.f32 %v2213_v30, %v2133_v54 }
 0x78e   :  { %2442 = vst [vmem:[#allocation5 + $0x70] sm:$0xff] %v2426_v18 }
 0x78f   :  { %v2427_v56 = vadd.f32 %v4864_v31, %v2229_v22 }
 0x791   :  { %2443 = vst [vmem:[#allocation5 + $0x78] sm:$0xff] %v2427_v56 }
 0x792   :  { %2994 = shalt.err (!%p2991_p12)
}
 0x793   :  { %s2995_s17 = scalar_lea.hbm %s4921_s6, 2048 }
 0x794   :  { %p2996_p13 = scmp.ne.s32.totalorder %s4921_s6, %s2995_s17  ;;  %p2999_p0 = scmp.lt.u32.totalorder %s2995_s17, %s4921_s6 }
 0x796   :  { %p3001_p1 = pnand %p2999_p0, %p2996_p13 }
 0x798   :  { %3004 = shalt.err (!%p3001_p1)
}
 0x799   :  { %s3017_s22 = smov 128   ;;  %s3018_s3 = smov 8  }
 0x79a   :  { %2455 = dma.vmem_to_hbm [thread:$0]  %s2450_s13, 2048, %s4921_s6, [#allocation4], %s3017_s22, %s3017_s22, %s3018_s3  }
 0x79b   :  { %3007 = dma.done.wait [#allocation4], 2048  }
 0x79c   :  { %3008 = vsyncadd [#allocation4], 4294965248 }
 0x79d   :  { %2463 = vsyncpa [#allocation3], 1 }
 0x79e   :  { %2464 = vsyncpa [#allocation4], 1 }

</bundles_post_ra>
